<compile_context>
chip_gen: v5e
topology: v5e:2x2
jax: 0.10.0
libtpu: 0.0.40
codegen_flags: <defaults>
</compile_context>

<pallas_src>
import jax
import jax.numpy as jnp
from jax import lax
from jax.experimental import pallas as pl
from jax.experimental.pallas import tpu as pltpu

INPUT_SIZE = 66
HIDDEN_SIZE = 30
OUTPUT_SIZE = 1
NUM_LAYERS = 2

_HP = 32  # hidden size padded to 32 so that 4 * HP == 128 (one vreg of lanes)


def _lstm_reg_kernel(pre_ref, whh0_ref, w1_ref, b1_ref, wreg_ref, y_ref,
                     h0_sc, c0_sc, h1_sc, c1_sc):
    """One grid step processes a chunk of timesteps.

    pre_ref : (T_CHUNK, B_pad, 4*HP)  precomputed x @ W_ih0 + b0 per step
    whh0_ref: (HP, 4*HP)              layer-0 recurrent weights (transposed)
    w1_ref  : (2*HP, 4*HP)            fused [W_ih1; W_hh1] (transposed)
    b1_ref  : (1, 4*HP)               layer-1 combined bias
    wreg_ref: (1, HP)                 regression weights (bias added in wrapper)
    y_ref   : (1, B_pad, T_CHUNK)     per-chunk output (time on lane axis)
    """
    hp = h0_sc.shape[-1]
    n_b = h0_sc.shape[0]
    n_steps = pre_ref.shape[0]

    @pl.when(pl.program_id(0) == 0)
    def _():
        h0_sc[...] = jnp.zeros_like(h0_sc)
        c0_sc[...] = jnp.zeros_like(c0_sc)
        h1_sc[...] = jnp.zeros_like(h1_sc)
        c1_sc[...] = jnp.zeros_like(c1_sc)

    # Hoist weight / bias loads and broadcasts out of the unrolled loop.
    whh0 = whh0_ref[...]                                        # (HP, 128)
    w1 = w1_ref[...]                                            # (2HP, 128)
    b1 = jnp.broadcast_to(b1_ref[...], (n_b, 4 * hp))           # (B, 128)
    wreg = jnp.broadcast_to(wreg_ref[...], (n_b, hp))           # (B, HP)

    h0 = h0_sc[...]
    c0 = c0_sc[...]
    h1 = h1_sc[...]
    c1 = c1_sc[...]

    def gate_math(gates, c):
        # gate order matches PyTorch: [i, f, g, o]; slices are 32-lane aligned
        i = jax.nn.sigmoid(gates[:, 0 * hp:1 * hp])
        f = jax.nn.sigmoid(gates[:, 1 * hp:2 * hp])
        g = jnp.tanh(gates[:, 2 * hp:3 * hp])
        o = jax.nn.sigmoid(gates[:, 3 * hp:4 * hp])
        c_new = f * c + i * g
        h_new = o * jnp.tanh(c_new)
        return h_new, c_new

    for t in range(n_steps):
        # layer 0: input projection precomputed in the wrapper; only the
        # recurrent matmul sits on the serial dependence chain.
        g0 = pre_ref[t] + jnp.dot(h0, whh0, preferred_element_type=jnp.float32)
        h0, c0 = gate_math(g0, c0)

        # layer 1: one fused matmul on the concatenated [h0 | h1] input.
        g1 = jnp.dot(jnp.concatenate([h0, h1], axis=1), w1,
                     preferred_element_type=jnp.float32) + b1
        h1, c1 = gate_math(g1, c1)

        # regression head (bias folded into the wrapper); VPU mul + lane
        # reduce, off the recurrence critical path.
        y_ref[0, :, t:t + 1] = jnp.sum(h1 * wreg, axis=1, keepdims=True)

    # persist recurrent state for the next chunk
    h0_sc[...] = h0
    c0_sc[...] = c0
    h1_sc[...] = h1
    c1_sc[...] = c1


def _round_up(v, m):
    return ((v + m - 1) // m) * m


def _pad_gate_rows(w, h, hp):
    """Pad a (4H, ...) PyTorch-layout gate-stacked array to (4*HP, ...)."""
    parts = jnp.split(w, 4, axis=0)
    pad_width = ((0, hp - h),) + ((0, 0),) * (w.ndim - 1)
    return jnp.concatenate([jnp.pad(p, pad_width) for p in parts], axis=0)


def lstm_reg_forward(x, params, t_chunk=32):
    """x: (B, T, INPUT_SIZE) float32 -> (B, T, OUTPUT_SIZE) float32."""
    B, T, D = x.shape
    H, HP = HIDDEN_SIZE, _HP
    BP = _round_up(max(B, 1), 8)
    TC = min(t_chunk, T)
    TP = _round_up(T, TC)
    n_chunks = TP // TC

    # ---- weight preparation (all padding columns/rows are zero) ----
    # layer 0
    wih0 = _pad_gate_rows(params["w_ih_l0"], H, HP).T                    # (D, 128)
    b0 = _pad_gate_rows((params["b_ih_l0"] + params["b_hh_l0"])[:, None],
                        H, HP)[:, 0]                                     # (128,)
    whh0 = jnp.pad(_pad_gate_rows(params["w_hh_l0"], H, HP),
                   ((0, 0), (0, HP - H))).T                              # (32, 128)
    # layer 1 (fused input/recurrent weights)
    wih1 = jnp.pad(_pad_gate_rows(params["w_ih_l1"], H, HP),
                   ((0, 0), (0, HP - H))).T                              # (32, 128)
    whh1 = jnp.pad(_pad_gate_rows(params["w_hh_l1"], H, HP),
                   ((0, 0), (0, HP - H))).T                              # (32, 128)
    w1 = jnp.concatenate([wih1, whh1], axis=0)                           # (64, 128)
    b1 = _pad_gate_rows((params["b_ih_l1"] + params["b_hh_l1"])[:, None],
                        H, HP)[:, 0][None, :]                            # (1, 128)
    # regression head
    wreg = jnp.pad(params["w_reg"], ((0, 0), (0, HP - H)))               # (1, 32)

    # ---- hoisted layer-0 input projection: one big matmul over all steps ----
    x_tm = jnp.transpose(x, (1, 0, 2))                                   # (T, B, D)
    x_tm = jnp.pad(x_tm, ((0, TP - T), (0, BP - B), (0, 0)))             # (TP, BP, D)
    pre0 = (x_tm.reshape(TP * BP, D) @ wih0 + b0).reshape(TP, BP, 4 * HP)

    y = pl.pallas_call(
        _lstm_reg_kernel,
        out_shape=jax.ShapeDtypeStruct((n_chunks, BP, TC), jnp.float32),
        grid_spec=pltpu.PrefetchScalarGridSpec(
            num_scalar_prefetch=0,
            grid=(n_chunks,),
            in_specs=[
                pl.BlockSpec((TC, BP, 4 * HP), lambda i: (i, 0, 0)),   # pre0
                pl.BlockSpec(whh0.shape, lambda i: (0, 0)),            # whh0
                pl.BlockSpec(w1.shape, lambda i: (0, 0)),              # w1
                pl.BlockSpec(b1.shape, lambda i: (0, 0)),              # b1
                pl.BlockSpec(wreg.shape, lambda i: (0, 0)),            # wreg
            ],
            out_specs=pl.BlockSpec((1, BP, TC), lambda i: (i, 0, 0)),
            scratch_shapes=[pltpu.VMEM((BP, HP), jnp.float32)
                            for _ in range(4)],                         # h0,c0,h1,c1
        ),
        compiler_params=pltpu.CompilerParams(
            dimension_semantics=("arbitrary",),  # serial recurrence over time
        ),
    )(pre0, whh0, w1, b1, wreg)

    # (n_chunks, BP, TC) -> (BP, TP) -> (B, T, 1) + regression bias
    y = jnp.transpose(y, (1, 0, 2)).reshape(BP, TP)
    return y[:B, :T, None] + params["b_reg"]


def lstm_reg_reference(x, params):
    """Pure-JAX reference matching PyTorch nn.LSTM + nn.Linear semantics."""
    B, T, D = x.shape
    H = HIDDEN_SIZE

    def cell(inp, h, c, w_ih, w_hh, b_ih, b_hh):
        gates = inp @ w_ih.T + b_ih + h @ w_hh.T + b_hh
        i = jax.nn.sigmoid(gates[:, 0 * H:1 * H])
        f = jax.nn.sigmoid(gates[:, 1 * H:2 * H])
        g = jnp.tanh(gates[:, 2 * H:3 * H])
        o = jax.nn.sigmoid(gates[:, 3 * H:4 * H])
        c_new = f * c + i * g
        h_new = o * jnp.tanh(c_new)
        return h_new, c_new

    def step(carry, x_t):
        h0, c0, h1, c1 = carry
        h0, c0 = cell(x_t, h0, c0, params["w_ih_l0"], params["w_hh_l0"],
                      params["b_ih_l0"], params["b_hh_l0"])
        h1, c1 = cell(h0, h1, c1, params["w_ih_l1"], params["w_hh_l1"],
                      params["b_ih_l1"], params["b_hh_l1"])
        y_t = h1 @ params["w_reg"].T + params["b_reg"]
        return (h0, c0, h1, c1), y_t

    zeros = jnp.zeros((B, H), jnp.float32)
    x_tm = jnp.transpose(x, (1, 0, 2))
    _, ys = lax.scan(step, (zeros, zeros, zeros, zeros), x_tm)
    return jnp.transpose(ys, (1, 0, 2))


def init_params(key):
    """Deterministic synthetic init mimicking PyTorch's U(-1/sqrt(H), 1/sqrt(H))."""
    H, D, O = HIDDEN_SIZE, INPUT_SIZE, OUTPUT_SIZE
    k = 1.0 / jnp.sqrt(jnp.float32(H))
    shapes = {
        "w_ih_l0": (4 * H, D), "w_hh_l0": (4 * H, H),
        "b_ih_l0": (4 * H,), "b_hh_l0": (4 * H,),
        "w_ih_l1": (4 * H, H), "w_hh_l1": (4 * H, H),
        "b_ih_l1": (4 * H,), "b_hh_l1": (4 * H,),
        "w_reg": (O, H), "b_reg": (O,),
    }
    params = {}
    keys = jax.random.split(key, len(shapes))
    for (name, shape), kk in zip(shapes.items(), keys):
        params[name] = jax.random.uniform(kk, shape, jnp.float32, minval=-k, maxval=k)
    return params


if __name__ == "__main__":
    B, T = 2, 8  # small shapes; feature dim fixed by the module (input_size=66)
    key = jax.random.PRNGKey(0)
    kx, kp = jax.random.split(key)
    x = jax.random.normal(kx, (B, T, INPUT_SIZE), jnp.float32)
    params = init_params(kp)

    fwd = jax.jit(lstm_reg_forward)
    y = jax.block_until_ready(fwd(x, params))
    y_ref = jax.block_until_ready(lstm_reg_reference(x, params))

    assert y.shape == (B, T, OUTPUT_SIZE), y.shape
    assert jnp.allclose(y, y_ref, atol=1e-3, rtol=1e-3), (
        float(jnp.max(jnp.abs(y - y_ref))))
    print("KERNEL_OK")
</pallas_src>

<mosaic_0001>
module attributes {stable_mosaic.version = 11 : i64} {
  func.func @_lstm_reg_kernel(%arg0: i32, %arg1: memref<8x8x128xf32, #tpu.memory_space<vmem>>, %arg2: memref<32x128xf32, #tpu.memory_space<vmem>>, %arg3: memref<64x128xf32, #tpu.memory_space<vmem>>, %arg4: memref<1x128xf32, #tpu.memory_space<vmem>>, %arg5: memref<1x32xf32, #tpu.memory_space<vmem>>, %arg6: memref<1x8x8xf32, #tpu.memory_space<vmem>>, %arg7: memref<8x32xf32, #tpu.memory_space<vmem>>, %arg8: memref<8x32xf32, #tpu.memory_space<vmem>>, %arg9: memref<8x32xf32, #tpu.memory_space<vmem>>, %arg10: memref<8x32xf32, #tpu.memory_space<vmem>>) attributes {dimension_semantics = [#tpu.dimension_semantics<arbitrary>], iteration_bounds = array<i64: 1>, scalar_prefetch = 0 : i64, scratch_operands = 4 : i64, tpu.core_type = #tpu.core_type<tc>, window_params = [{transform_indices = @transform_0, window_bounds = array<i64: 8, 8, 128>}, {pipeline_mode = #tpu.pipeline_mode<synchronous>, transform_indices = @transform_1, window_bounds = array<i64: 32, 128>}, {pipeline_mode = #tpu.pipeline_mode<synchronous>, transform_indices = @transform_2, window_bounds = array<i64: 64, 128>}, {pipeline_mode = #tpu.pipeline_mode<synchronous>, transform_indices = @transform_3, window_bounds = array<i64: 1, 128>}, {pipeline_mode = #tpu.pipeline_mode<synchronous>, transform_indices = @transform_4, window_bounds = array<i64: 1, 32>}, {transform_indices = @transform_5, window_bounds = array<i64: 1, 8, 8>}]} {
    %c0_i32 = arith.constant 0 : i32
    %0 = arith.cmpi eq, %arg0, %c0_i32 : i32
    %1 = arith.extui %0 : i1 to i32
    %c0_i32_0 = arith.constant 0 : i32
    %2 = arith.cmpi ne, %1, %c0_i32_0 : i32
    scf.if %2 {
      %cst_136 = arith.constant 0.000000e+00 : f32
      %523 = vector.broadcast %cst_136 : f32 to vector<8x32xf32>
      %c0_137 = arith.constant 0 : index
      %c0_138 = arith.constant 0 : index
      %524 = vector.load %arg7[%c0_137, %c0_138] : memref<8x32xf32, #tpu.memory_space<vmem>>, vector<8x32xf32>
      tpu.vector_store %arg7[%c0_137, %c0_138], %523 {strides = array<i32>} : memref<8x32xf32, #tpu.memory_space<vmem>>, vector<8x32xf32>,
      %cst_139 = arith.constant 0.000000e+00 : f32
      %525 = vector.broadcast %cst_139 : f32 to vector<8x32xf32>
      %c0_140 = arith.constant 0 : index
      %c0_141 = arith.constant 0 : index
      %526 = vector.load %arg8[%c0_140, %c0_141] : memref<8x32xf32, #tpu.memory_space<vmem>>, vector<8x32xf32>
      tpu.vector_store %arg8[%c0_140, %c0_141], %525 {strides = array<i32>} : memref<8x32xf32, #tpu.memory_space<vmem>>, vector<8x32xf32>,
      %cst_142 = arith.constant 0.000000e+00 : f32
      %527 = vector.broadcast %cst_142 : f32 to vector<8x32xf32>
      %c0_143 = arith.constant 0 : index
      %c0_144 = arith.constant 0 : index
      %528 = vector.load %arg9[%c0_143, %c0_144] : memref<8x32xf32, #tpu.memory_space<vmem>>, vector<8x32xf32>
      tpu.vector_store %arg9[%c0_143, %c0_144], %527 {strides = array<i32>} : memref<8x32xf32, #tpu.memory_space<vmem>>, vector<8x32xf32>,
      %cst_145 = arith.constant 0.000000e+00 : f32
      %529 = vector.broadcast %cst_145 : f32 to vector<8x32xf32>
      %c0_146 = arith.constant 0 : index
      %c0_147 = arith.constant 0 : index
      %530 = vector.load %arg10[%c0_146, %c0_147] : memref<8x32xf32, #tpu.memory_space<vmem>>, vector<8x32xf32>
      tpu.vector_store %arg10[%c0_146, %c0_147], %529 {strides = array<i32>} : memref<8x32xf32, #tpu.memory_space<vmem>>, vector<8x32xf32>,
    } else {
    }
    %c0 = arith.constant 0 : index
    %c0_1 = arith.constant 0 : index
    %3 = vector.load %arg2[%c0, %c0_1] : memref<32x128xf32, #tpu.memory_space<vmem>>, vector<32x128xf32>
    %c0_2 = arith.constant 0 : index
    %c0_3 = arith.constant 0 : index
    %4 = vector.load %arg3[%c0_2, %c0_3] : memref<64x128xf32, #tpu.memory_space<vmem>>, vector<64x128xf32>
    %c0_4 = arith.constant 0 : index
    %c0_5 = arith.constant 0 : index
    %5 = vector.load %arg4[%c0_4, %c0_5] : memref<1x128xf32, #tpu.memory_space<vmem>>, vector<1x128xf32>
    %6 = vector.shape_cast %5 : vector<1x128xf32> to vector<1x128xf32>
    %7 = vector.broadcast %6 : vector<1x128xf32> to vector<8x128xf32>
    %c0_6 = arith.constant 0 : index
    %c0_7 = arith.constant 0 : index
    %8 = vector.load %arg5[%c0_6, %c0_7] : memref<1x32xf32, #tpu.memory_space<vmem>>, vector<1x32xf32>
    %9 = vector.shape_cast %8 : vector<1x32xf32> to vector<1x32xf32>
    %10 = vector.broadcast %9 : vector<1x32xf32> to vector<8x32xf32>
    %c0_8 = arith.constant 0 : index
    %c0_9 = arith.constant 0 : index
    %11 = vector.load %arg7[%c0_8, %c0_9] : memref<8x32xf32, #tpu.memory_space<vmem>>, vector<8x32xf32>
    %c0_10 = arith.constant 0 : index
    %c0_11 = arith.constant 0 : index
    %12 = vector.load %arg8[%c0_10, %c0_11] : memref<8x32xf32, #tpu.memory_space<vmem>>, vector<8x32xf32>
    %c0_12 = arith.constant 0 : index
    %c0_13 = arith.constant 0 : index
    %13 = vector.load %arg9[%c0_12, %c0_13] : memref<8x32xf32, #tpu.memory_space<vmem>>, vector<8x32xf32>
    %c0_14 = arith.constant 0 : index
    %c0_15 = arith.constant 0 : index
    %14 = vector.load %arg10[%c0_14, %c0_15] : memref<8x32xf32, #tpu.memory_space<vmem>>, vector<8x32xf32>
    %c0_16 = arith.constant 0 : index
    %c0_17 = arith.constant 0 : index
    %c0_18 = arith.constant 0 : index
    %15 = vector.load %arg1[%c0_16, %c0_17, %c0_18] : memref<8x8x128xf32, #tpu.memory_space<vmem>>, vector<1x8x128xf32>
    %16 = vector.shape_cast %15 : vector<1x8x128xf32> to vector<8x128xf32>
    %cst = arith.constant dense<0.000000e+00> : vector<8x128xf32>
    %17 = tpu.matmul %11, %3, %cst {dimension_numbers = #tpu.dot_dimension_numbers<[1], [0], [0], [1], [0, 0, 1, 1], [], []>} : vector<8x32xf32>, vector<32x128xf32>, vector<8x128xf32> -> vector<8x128xf32>
    %18 = arith.addf %16, %17 : vector<8x128xf32>
    %19 = vector.extract_strided_slice %18 {offsets = [0, 0], sizes = [8, 32], strides = [1, 1]} : vector<8x128xf32> to vector<8x32xf32>
    %20 = arith.negf %19 : vector<8x32xf32>
    %21 = math.exp %20 : vector<8x32xf32>
    %cst_19 = arith.constant 1.000000e+00 : f32
    %22 = vector.broadcast %cst_19 : f32 to vector<8x32xf32>
    %23 = arith.addf %22, %21 : vector<8x32xf32>
    %24 = arith.divf %22, %23 : vector<8x32xf32>
    %25 = vector.extract_strided_slice %18 {offsets = [0, 32], sizes = [8, 32], strides = [1, 1]} : vector<8x128xf32> to vector<8x32xf32>
    %26 = arith.negf %25 : vector<8x32xf32>
    %27 = math.exp %26 : vector<8x32xf32>
    %cst_20 = arith.constant 1.000000e+00 : f32
    %28 = vector.broadcast %cst_20 : f32 to vector<8x32xf32>
    %29 = arith.addf %28, %27 : vector<8x32xf32>
    %30 = arith.divf %28, %29 : vector<8x32xf32>
    %31 = vector.extract_strided_slice %18 {offsets = [0, 64], sizes = [8, 32], strides = [1, 1]} : vector<8x128xf32> to vector<8x32xf32>
    %32 = math.tanh %31 : vector<8x32xf32>
    %33 = vector.extract_strided_slice %18 {offsets = [0, 96], sizes = [8, 32], strides = [1, 1]} : vector<8x128xf32> to vector<8x32xf32>
    %34 = arith.negf %33 : vector<8x32xf32>
    %35 = math.exp %34 : vector<8x32xf32>
    %cst_21 = arith.constant 1.000000e+00 : f32
    %36 = vector.broadcast %cst_21 : f32 to vector<8x32xf32>
    %37 = arith.addf %36, %35 : vector<8x32xf32>
    %38 = arith.divf %36, %37 : vector<8x32xf32>
    %39 = arith.mulf %30, %12 : vector<8x32xf32>
    %40 = arith.mulf %24, %32 : vector<8x32xf32>
    %41 = arith.addf %39, %40 : vector<8x32xf32>
    %42 = math.tanh %41 : vector<8x32xf32>
    %43 = arith.mulf %38, %42 : vector<8x32xf32>
    %44 = tpu.concatenate %43, %13 in 1 : vector<8x32xf32>, vector<8x32xf32> -> vector<8x64xf32>
    %cst_22 = arith.constant dense<0.000000e+00> : vector<8x128xf32>
    %45 = tpu.matmul %44, %4, %cst_22 {dimension_numbers = #tpu.dot_dimension_numbers<[1], [0], [0], [1], [0, 0, 1, 1], [], []>} : vector<8x64xf32>, vector<64x128xf32>, vector<8x128xf32> -> vector<8x128xf32>
    %46 = arith.addf %45, %7 : vector<8x128xf32>
    %47 = vector.extract_strided_slice %46 {offsets = [0, 0], sizes = [8, 32], strides = [1, 1]} : vector<8x128xf32> to vector<8x32xf32>
    %48 = arith.negf %47 : vector<8x32xf32>
    %49 = math.exp %48 : vector<8x32xf32>
    %cst_23 = arith.constant 1.000000e+00 : f32
    %50 = vector.broadcast %cst_23 : f32 to vector<8x32xf32>
    %51 = arith.addf %50, %49 : vector<8x32xf32>
    %52 = arith.divf %50, %51 : vector<8x32xf32>
    %53 = vector.extract_strided_slice %46 {offsets = [0, 32], sizes = [8, 32], strides = [1, 1]} : vector<8x128xf32> to vector<8x32xf32>
    %54 = arith.negf %53 : vector<8x32xf32>
    %55 = math.exp %54 : vector<8x32xf32>
    %cst_24 = arith.constant 1.000000e+00 : f32
    %56 = vector.broadcast %cst_24 : f32 to vector<8x32xf32>
    %57 = arith.addf %56, %55 : vector<8x32xf32>
    %58 = arith.divf %56, %57 : vector<8x32xf32>
    %59 = vector.extract_strided_slice %46 {offsets = [0, 64], sizes = [8, 32], strides = [1, 1]} : vector<8x128xf32> to vector<8x32xf32>
    %60 = math.tanh %59 : vector<8x32xf32>
    %61 = vector.extract_strided_slice %46 {offsets = [0, 96], sizes = [8, 32], strides = [1, 1]} : vector<8x128xf32> to vector<8x32xf32>
    %62 = arith.negf %61 : vector<8x32xf32>
    %63 = math.exp %62 : vector<8x32xf32>
    %cst_25 = arith.constant 1.000000e+00 : f32
    %64 = vector.broadcast %cst_25 : f32 to vector<8x32xf32>
    %65 = arith.addf %64, %63 : vector<8x32xf32>
    %66 = arith.divf %64, %65 : vector<8x32xf32>
    %67 = arith.mulf %58, %14 : vector<8x32xf32>
    %68 = arith.mulf %52, %60 : vector<8x32xf32>
    %69 = arith.addf %67, %68 : vector<8x32xf32>
    %70 = math.tanh %69 : vector<8x32xf32>
    %71 = arith.mulf %66, %70 : vector<8x32xf32>
    %72 = arith.mulf %71, %10 : vector<8x32xf32>
    %cst_26 = arith.constant dense<0.000000e+00> : vector<8xf32>
    %73 = vector.multi_reduction <add>, %72, %cst_26 [1] : vector<8x32xf32> to vector<8xf32>
    %74 = vector.shape_cast %73 : vector<8xf32> to vector<8x1xf32>
    %c0_27 = arith.constant 0 : index
    %c0_28 = arith.constant 0 : index
    %c0_29 = arith.constant 0 : index
    %75 = vector.load %arg6[%c0_27, %c0_28, %c0_29] : memref<1x8x8xf32, #tpu.memory_space<vmem>>, vector<1x8x1xf32>
    %76 = vector.shape_cast %75 : vector<1x8x1xf32> to vector<8x1xf32>
    %77 = vector.shape_cast %74 : vector<8x1xf32> to vector<1x8x1xf32>
    tpu.vector_store %arg6[%c0_27, %c0_28, %c0_29], %77 {strides = array<i32>} : memref<1x8x8xf32, #tpu.memory_space<vmem>>, vector<1x8x1xf32>,
    %c1 = arith.constant 1 : index
    %c0_30 = arith.constant 0 : index
    %c0_31 = arith.constant 0 : index
    %78 = vector.load %arg1[%c1, %c0_30, %c0_31] : memref<8x8x128xf32, #tpu.memory_space<vmem>>, vector<1x8x128xf32>
    %79 = vector.shape_cast %78 : vector<1x8x128xf32> to vector<8x128xf32>
    %cst_32 = arith.constant dense<0.000000e+00> : vector<8x128xf32>
    %80 = tpu.matmul %43, %3, %cst_32 {dimension_numbers = #tpu.dot_dimension_numbers<[1], [0], [0], [1], [0, 0, 1, 1], [], []>} : vector<8x32xf32>, vector<32x128xf32>, vector<8x128xf32> -> vector<8x128xf32>
    %81 = arith.addf %79, %80 : vector<8x128xf32>
    %82 = vector.extract_strided_slice %81 {offsets = [0, 0], sizes = [8, 32], strides = [1, 1]} : vector<8x128xf32> to vector<8x32xf32>
    %83 = arith.negf %82 : vector<8x32xf32>
    %84 = math.exp %83 : vector<8x32xf32>
    %cst_33 = arith.constant 1.000000e+00 : f32
    %85 = vector.broadcast %cst_33 : f32 to vector<8x32xf32>
    %86 = arith.addf %85, %84 : vector<8x32xf32>
    %87 = arith.divf %85, %86 : vector<8x32xf32>
    %88 = vector.extract_strided_slice %81 {offsets = [0, 32], sizes = [8, 32], strides = [1, 1]} : vector<8x128xf32> to vector<8x32xf32>
    %89 = arith.negf %88 : vector<8x32xf32>
    %90 = math.exp %89 : vector<8x32xf32>
    %cst_34 = arith.constant 1.000000e+00 : f32
    %91 = vector.broadcast %cst_34 : f32 to vector<8x32xf32>
    %92 = arith.addf %91, %90 : vector<8x32xf32>
    %93 = arith.divf %91, %92 : vector<8x32xf32>
    %94 = vector.extract_strided_slice %81 {offsets = [0, 64], sizes = [8, 32], strides = [1, 1]} : vector<8x128xf32> to vector<8x32xf32>
    %95 = math.tanh %94 : vector<8x32xf32>
    %96 = vector.extract_strided_slice %81 {offsets = [0, 96], sizes = [8, 32], strides = [1, 1]} : vector<8x128xf32> to vector<8x32xf32>
    %97 = arith.negf %96 : vector<8x32xf32>
    %98 = math.exp %97 : vector<8x32xf32>
    %cst_35 = arith.constant 1.000000e+00 : f32
    %99 = vector.broadcast %cst_35 : f32 to vector<8x32xf32>
    %100 = arith.addf %99, %98 : vector<8x32xf32>
    %101 = arith.divf %99, %100 : vector<8x32xf32>
    %102 = arith.mulf %93, %41 : vector<8x32xf32>
    %103 = arith.mulf %87, %95 : vector<8x32xf32>
    %104 = arith.addf %102, %103 : vector<8x32xf32>
    %105 = math.tanh %104 : vector<8x32xf32>
    %106 = arith.mulf %101, %105 : vector<8x32xf32>
    %107 = tpu.concatenate %106, %71 in 1 : vector<8x32xf32>, vector<8x32xf32> -> vector<8x64xf32>
    %cst_36 = arith.constant dense<0.000000e+00> : vector<8x128xf32>
    %108 = tpu.matmul %107, %4, %cst_36 {dimension_numbers = #tpu.dot_dimension_numbers<[1], [0], [0], [1], [0, 0, 1, 1], [], []>} : vector<8x64xf32>, vector<64x128xf32>, vector<8x128xf32> -> vector<8x128xf32>
    %109 = arith.addf %108, %7 : vector<8x128xf32>
    %110 = vector.extract_strided_slice %109 {offsets = [0, 0], sizes = [8, 32], strides = [1, 1]} : vector<8x128xf32> to vector<8x32xf32>
    %111 = arith.negf %110 : vector<8x32xf32>
    %112 = math.exp %111 : vector<8x32xf32>
    %cst_37 = arith.constant 1.000000e+00 : f32
    %113 = vector.broadcast %cst_37 : f32 to vector<8x32xf32>
    %114 = arith.addf %113, %112 : vector<8x32xf32>
    %115 = arith.divf %113, %114 : vector<8x32xf32>
    %116 = vector.extract_strided_slice %109 {offsets = [0, 32], sizes = [8, 32], strides = [1, 1]} : vector<8x128xf32> to vector<8x32xf32>
    %117 = arith.negf %116 : vector<8x32xf32>
    %118 = math.exp %117 : vector<8x32xf32>
    %cst_38 = arith.constant 1.000000e+00 : f32
    %119 = vector.broadcast %cst_38 : f32 to vector<8x32xf32>
    %120 = arith.addf %119, %118 : vector<8x32xf32>
    %121 = arith.divf %119, %120 : vector<8x32xf32>
    %122 = vector.extract_strided_slice %109 {offsets = [0, 64], sizes = [8, 32], strides = [1, 1]} : vector<8x128xf32> to vector<8x32xf32>
    %123 = math.tanh %122 : vector<8x32xf32>
    %124 = vector.extract_strided_slice %109 {offsets = [0, 96], sizes = [8, 32], strides = [1, 1]} : vector<8x128xf32> to vector<8x32xf32>
    %125 = arith.negf %124 : vector<8x32xf32>
    %126 = math.exp %125 : vector<8x32xf32>
    %cst_39 = arith.constant 1.000000e+00 : f32
    %127 = vector.broadcast %cst_39 : f32 to vector<8x32xf32>
    %128 = arith.addf %127, %126 : vector<8x32xf32>
    %129 = arith.divf %127, %128 : vector<8x32xf32>
    %130 = arith.mulf %121, %69 : vector<8x32xf32>
    %131 = arith.mulf %115, %123 : vector<8x32xf32>
    %132 = arith.addf %130, %131 : vector<8x32xf32>
    %133 = math.tanh %132 : vector<8x32xf32>
    %134 = arith.mulf %129, %133 : vector<8x32xf32>
    %135 = arith.mulf %134, %10 : vector<8x32xf32>
    %cst_40 = arith.constant dense<0.000000e+00> : vector<8xf32>
    %136 = vector.multi_reduction <add>, %135, %cst_40 [1] : vector<8x32xf32> to vector<8xf32>
    %137 = vector.shape_cast %136 : vector<8xf32> to vector<8x1xf32>
    %c0_41 = arith.constant 0 : index
    %c0_42 = arith.constant 0 : index
    %c1_43 = arith.constant 1 : index
    %138 = vector.load %arg6[%c0_41, %c0_42, %c1_43] : memref<1x8x8xf32, #tpu.memory_space<vmem>>, vector<1x8x1xf32>
    %139 = vector.shape_cast %138 : vector<1x8x1xf32> to vector<8x1xf32>
    %140 = vector.shape_cast %137 : vector<8x1xf32> to vector<1x8x1xf32>
    tpu.vector_store %arg6[%c0_41, %c0_42, %c1_43], %140 {strides = array<i32>} : memref<1x8x8xf32, #tpu.memory_space<vmem>>, vector<1x8x1xf32>,
    %c2 = arith.constant 2 : index
    %c0_44 = arith.constant 0 : index
    %c0_45 = arith.constant 0 : index
    %141 = vector.load %arg1[%c2, %c0_44, %c0_45] : memref<8x8x128xf32, #tpu.memory_space<vmem>>, vector<1x8x128xf32>
    %142 = vector.shape_cast %141 : vector<1x8x128xf32> to vector<8x128xf32>
    %cst_46 = arith.constant dense<0.000000e+00> : vector<8x128xf32>
    %143 = tpu.matmul %106, %3, %cst_46 {dimension_numbers = #tpu.dot_dimension_numbers<[1], [0], [0], [1], [0, 0, 1, 1], [], []>} : vector<8x32xf32>, vector<32x128xf32>, vector<8x128xf32> -> vector<8x128xf32>
    %144 = arith.addf %142, %143 : vector<8x128xf32>
    %145 = vector.extract_strided_slice %144 {offsets = [0, 0], sizes = [8, 32], strides = [1, 1]} : vector<8x128xf32> to vector<8x32xf32>
    %146 = arith.negf %145 : vector<8x32xf32>
    %147 = math.exp %146 : vector<8x32xf32>
    %cst_47 = arith.constant 1.000000e+00 : f32
    %148 = vector.broadcast %cst_47 : f32 to vector<8x32xf32>
    %149 = arith.addf %148, %147 : vector<8x32xf32>
    %150 = arith.divf %148, %149 : vector<8x32xf32>
    %151 = vector.extract_strided_slice %144 {offsets = [0, 32], sizes = [8, 32], strides = [1, 1]} : vector<8x128xf32> to vector<8x32xf32>
    %152 = arith.negf %151 : vector<8x32xf32>
    %153 = math.exp %152 : vector<8x32xf32>
    %cst_48 = arith.constant 1.000000e+00 : f32
    %154 = vector.broadcast %cst_48 : f32 to vector<8x32xf32>
    %155 = arith.addf %154, %153 : vector<8x32xf32>
    %156 = arith.divf %154, %155 : vector<8x32xf32>
    %157 = vector.extract_strided_slice %144 {offsets = [0, 64], sizes = [8, 32], strides = [1, 1]} : vector<8x128xf32> to vector<8x32xf32>
    %158 = math.tanh %157 : vector<8x32xf32>
    %159 = vector.extract_strided_slice %144 {offsets = [0, 96], sizes = [8, 32], strides = [1, 1]} : vector<8x128xf32> to vector<8x32xf32>
    %160 = arith.negf %159 : vector<8x32xf32>
    %161 = math.exp %160 : vector<8x32xf32>
    %cst_49 = arith.constant 1.000000e+00 : f32
    %162 = vector.broadcast %cst_49 : f32 to vector<8x32xf32>
    %163 = arith.addf %162, %161 : vector<8x32xf32>
    %164 = arith.divf %162, %163 : vector<8x32xf32>
    %165 = arith.mulf %156, %104 : vector<8x32xf32>
    %166 = arith.mulf %150, %158 : vector<8x32xf32>
    %167 = arith.addf %165, %166 : vector<8x32xf32>
    %168 = math.tanh %167 : vector<8x32xf32>
    %169 = arith.mulf %164, %168 : vector<8x32xf32>
    %170 = tpu.concatenate %169, %134 in 1 : vector<8x32xf32>, vector<8x32xf32> -> vector<8x64xf32>
    %cst_50 = arith.constant dense<0.000000e+00> : vector<8x128xf32>
    %171 = tpu.matmul %170, %4, %cst_50 {dimension_numbers = #tpu.dot_dimension_numbers<[1], [0], [0], [1], [0, 0, 1, 1], [], []>} : vector<8x64xf32>, vector<64x128xf32>, vector<8x128xf32> -> vector<8x128xf32>
    %172 = arith.addf %171, %7 : vector<8x128xf32>
    %173 = vector.extract_strided_slice %172 {offsets = [0, 0], sizes = [8, 32], strides = [1, 1]} : vector<8x128xf32> to vector<8x32xf32>
    %174 = arith.negf %173 : vector<8x32xf32>
    %175 = math.exp %174 : vector<8x32xf32>
    %cst_51 = arith.constant 1.000000e+00 : f32
    %176 = vector.broadcast %cst_51 : f32 to vector<8x32xf32>
    %177 = arith.addf %176, %175 : vector<8x32xf32>
    %178 = arith.divf %176, %177 : vector<8x32xf32>
    %179 = vector.extract_strided_slice %172 {offsets = [0, 32], sizes = [8, 32], strides = [1, 1]} : vector<8x128xf32> to vector<8x32xf32>
    %180 = arith.negf %179 : vector<8x32xf32>
    %181 = math.exp %180 : vector<8x32xf32>
    %cst_52 = arith.constant 1.000000e+00 : f32
    %182 = vector.broadcast %cst_52 : f32 to vector<8x32xf32>
    %183 = arith.addf %182, %181 : vector<8x32xf32>
    %184 = arith.divf %182, %183 : vector<8x32xf32>
    %185 = vector.extract_strided_slice %172 {offsets = [0, 64], sizes = [8, 32], strides = [1, 1]} : vector<8x128xf32> to vector<8x32xf32>
    %186 = math.tanh %185 : vector<8x32xf32>
    %187 = vector.extract_strided_slice %172 {offsets = [0, 96], sizes = [8, 32], strides = [1, 1]} : vector<8x128xf32> to vector<8x32xf32>
    %188 = arith.negf %187 : vector<8x32xf32>
    %189 = math.exp %188 : vector<8x32xf32>
    %cst_53 = arith.constant 1.000000e+00 : f32
    %190 = vector.broadcast %cst_53 : f32 to vector<8x32xf32>
    %191 = arith.addf %190, %189 : vector<8x32xf32>
    %192 = arith.divf %190, %191 : vector<8x32xf32>
    %193 = arith.mulf %184, %132 : vector<8x32xf32>
    %194 = arith.mulf %178, %186 : vector<8x32xf32>
    %195 = arith.addf %193, %194 : vector<8x32xf32>
    %196 = math.tanh %195 : vector<8x32xf32>
    %197 = arith.mulf %192, %196 : vector<8x32xf32>
    %198 = arith.mulf %197, %10 : vector<8x32xf32>
    %cst_54 = arith.constant dense<0.000000e+00> : vector<8xf32>
    %199 = vector.multi_reduction <add>, %198, %cst_54 [1] : vector<8x32xf32> to vector<8xf32>
    %200 = vector.shape_cast %199 : vector<8xf32> to vector<8x1xf32>
    %c0_55 = arith.constant 0 : index
    %c0_56 = arith.constant 0 : index
    %c2_57 = arith.constant 2 : index
    %201 = vector.load %arg6[%c0_55, %c0_56, %c2_57] : memref<1x8x8xf32, #tpu.memory_space<vmem>>, vector<1x8x1xf32>
    %202 = vector.shape_cast %201 : vector<1x8x1xf32> to vector<8x1xf32>
    %203 = vector.shape_cast %200 : vector<8x1xf32> to vector<1x8x1xf32>
    tpu.vector_store %arg6[%c0_55, %c0_56, %c2_57], %203 {strides = array<i32>} : memref<1x8x8xf32, #tpu.memory_space<vmem>>, vector<1x8x1xf32>,
    %c3 = arith.constant 3 : index
    %c0_58 = arith.constant 0 : index
    %c0_59 = arith.constant 0 : index
    %204 = vector.load %arg1[%c3, %c0_58, %c0_59] : memref<8x8x128xf32, #tpu.memory_space<vmem>>, vector<1x8x128xf32>
    %205 = vector.shape_cast %204 : vector<1x8x128xf32> to vector<8x128xf32>
    %cst_60 = arith.constant dense<0.000000e+00> : vector<8x128xf32>
    %206 = tpu.matmul %169, %3, %cst_60 {dimension_numbers = #tpu.dot_dimension_numbers<[1], [0], [0], [1], [0, 0, 1, 1], [], []>} : vector<8x32xf32>, vector<32x128xf32>, vector<8x128xf32> -> vector<8x128xf32>
    %207 = arith.addf %205, %206 : vector<8x128xf32>
    %208 = vector.extract_strided_slice %207 {offsets = [0, 0], sizes = [8, 32], strides = [1, 1]} : vector<8x128xf32> to vector<8x32xf32>
    %209 = arith.negf %208 : vector<8x32xf32>
    %210 = math.exp %209 : vector<8x32xf32>
    %cst_61 = arith.constant 1.000000e+00 : f32
    %211 = vector.broadcast %cst_61 : f32 to vector<8x32xf32>
    %212 = arith.addf %211, %210 : vector<8x32xf32>
    %213 = arith.divf %211, %212 : vector<8x32xf32>
    %214 = vector.extract_strided_slice %207 {offsets = [0, 32], sizes = [8, 32], strides = [1, 1]} : vector<8x128xf32> to vector<8x32xf32>
    %215 = arith.negf %214 : vector<8x32xf32>
    %216 = math.exp %215 : vector<8x32xf32>
    %cst_62 = arith.constant 1.000000e+00 : f32
    %217 = vector.broadcast %cst_62 : f32 to vector<8x32xf32>
    %218 = arith.addf %217, %216 : vector<8x32xf32>
    %219 = arith.divf %217, %218 : vector<8x32xf32>
    %220 = vector.extract_strided_slice %207 {offsets = [0, 64], sizes = [8, 32], strides = [1, 1]} : vector<8x128xf32> to vector<8x32xf32>
    %221 = math.tanh %220 : vector<8x32xf32>
    %222 = vector.extract_strided_slice %207 {offsets = [0, 96], sizes = [8, 32], strides = [1, 1]} : vector<8x128xf32> to vector<8x32xf32>
    %223 = arith.negf %222 : vector<8x32xf32>
    %224 = math.exp %223 : vector<8x32xf32>
    %cst_63 = arith.constant 1.000000e+00 : f32
    %225 = vector.broadcast %cst_63 : f32 to vector<8x32xf32>
    %226 = arith.addf %225, %224 : vector<8x32xf32>
    %227 = arith.divf %225, %226 : vector<8x32xf32>
    %228 = arith.mulf %219, %167 : vector<8x32xf32>
    %229 = arith.mulf %213, %221 : vector<8x32xf32>
    %230 = arith.addf %228, %229 : vector<8x32xf32>
    %231 = math.tanh %230 : vector<8x32xf32>
    %232 = arith.mulf %227, %231 : vector<8x32xf32>
    %233 = tpu.concatenate %232, %197 in 1 : vector<8x32xf32>, vector<8x32xf32> -> vector<8x64xf32>
    %cst_64 = arith.constant dense<0.000000e+00> : vector<8x128xf32>
    %234 = tpu.matmul %233, %4, %cst_64 {dimension_numbers = #tpu.dot_dimension_numbers<[1], [0], [0], [1], [0, 0, 1, 1], [], []>} : vector<8x64xf32>, vector<64x128xf32>, vector<8x128xf32> -> vector<8x128xf32>
    %235 = arith.addf %234, %7 : vector<8x128xf32>
    %236 = vector.extract_strided_slice %235 {offsets = [0, 0], sizes = [8, 32], strides = [1, 1]} : vector<8x128xf32> to vector<8x32xf32>
    %237 = arith.negf %236 : vector<8x32xf32>
    %238 = math.exp %237 : vector<8x32xf32>
    %cst_65 = arith.constant 1.000000e+00 : f32
    %239 = vector.broadcast %cst_65 : f32 to vector<8x32xf32>
    %240 = arith.addf %239, %238 : vector<8x32xf32>
    %241 = arith.divf %239, %240 : vector<8x32xf32>
    %242 = vector.extract_strided_slice %235 {offsets = [0, 32], sizes = [8, 32], strides = [1, 1]} : vector<8x128xf32> to vector<8x32xf32>
    %243 = arith.negf %242 : vector<8x32xf32>
    %244 = math.exp %243 : vector<8x32xf32>
    %cst_66 = arith.constant 1.000000e+00 : f32
    %245 = vector.broadcast %cst_66 : f32 to vector<8x32xf32>
    %246 = arith.addf %245, %244 : vector<8x32xf32>
    %247 = arith.divf %245, %246 : vector<8x32xf32>
    %248 = vector.extract_strided_slice %235 {offsets = [0, 64], sizes = [8, 32], strides = [1, 1]} : vector<8x128xf32> to vector<8x32xf32>
    %249 = math.tanh %248 : vector<8x32xf32>
    %250 = vector.extract_strided_slice %235 {offsets = [0, 96], sizes = [8, 32], strides = [1, 1]} : vector<8x128xf32> to vector<8x32xf32>
    %251 = arith.negf %250 : vector<8x32xf32>
    %252 = math.exp %251 : vector<8x32xf32>
    %cst_67 = arith.constant 1.000000e+00 : f32
    %253 = vector.broadcast %cst_67 : f32 to vector<8x32xf32>
    %254 = arith.addf %253, %252 : vector<8x32xf32>
    %255 = arith.divf %253, %254 : vector<8x32xf32>
    %256 = arith.mulf %247, %195 : vector<8x32xf32>
    %257 = arith.mulf %241, %249 : vector<8x32xf32>
    %258 = arith.addf %256, %257 : vector<8x32xf32>
    %259 = math.tanh %258 : vector<8x32xf32>
    %260 = arith.mulf %255, %259 : vector<8x32xf32>
    %261 = arith.mulf %260, %10 : vector<8x32xf32>
    %cst_68 = arith.constant dense<0.000000e+00> : vector<8xf32>
    %262 = vector.multi_reduction <add>, %261, %cst_68 [1] : vector<8x32xf32> to vector<8xf32>
    %263 = vector.shape_cast %262 : vector<8xf32> to vector<8x1xf32>
    %c0_69 = arith.constant 0 : index
    %c0_70 = arith.constant 0 : index
    %c3_71 = arith.constant 3 : index
    %264 = vector.load %arg6[%c0_69, %c0_70, %c3_71] : memref<1x8x8xf32, #tpu.memory_space<vmem>>, vector<1x8x1xf32>
    %265 = vector.shape_cast %264 : vector<1x8x1xf32> to vector<8x1xf32>
    %266 = vector.shape_cast %263 : vector<8x1xf32> to vector<1x8x1xf32>
    tpu.vector_store %arg6[%c0_69, %c0_70, %c3_71], %266 {strides = array<i32>} : memref<1x8x8xf32, #tpu.memory_space<vmem>>, vector<1x8x1xf32>,
    %c4 = arith.constant 4 : index
    %c0_72 = arith.constant 0 : index
    %c0_73 = arith.constant 0 : index
    %267 = vector.load %arg1[%c4, %c0_72, %c0_73] : memref<8x8x128xf32, #tpu.memory_space<vmem>>, vector<1x8x128xf32>
    %268 = vector.shape_cast %267 : vector<1x8x128xf32> to vector<8x128xf32>
    %cst_74 = arith.constant dense<0.000000e+00> : vector<8x128xf32>
    %269 = tpu.matmul %232, %3, %cst_74 {dimension_numbers = #tpu.dot_dimension_numbers<[1], [0], [0], [1], [0, 0, 1, 1], [], []>} : vector<8x32xf32>, vector<32x128xf32>, vector<8x128xf32> -> vector<8x128xf32>
    %270 = arith.addf %268, %269 : vector<8x128xf32>
    %271 = vector.extract_strided_slice %270 {offsets = [0, 0], sizes = [8, 32], strides = [1, 1]} : vector<8x128xf32> to vector<8x32xf32>
    %272 = arith.negf %271 : vector<8x32xf32>
    %273 = math.exp %272 : vector<8x32xf32>
    %cst_75 = arith.constant 1.000000e+00 : f32
    %274 = vector.broadcast %cst_75 : f32 to vector<8x32xf32>
    %275 = arith.addf %274, %273 : vector<8x32xf32>
    %276 = arith.divf %274, %275 : vector<8x32xf32>
    %277 = vector.extract_strided_slice %270 {offsets = [0, 32], sizes = [8, 32], strides = [1, 1]} : vector<8x128xf32> to vector<8x32xf32>
    %278 = arith.negf %277 : vector<8x32xf32>
    %279 = math.exp %278 : vector<8x32xf32>
    %cst_76 = arith.constant 1.000000e+00 : f32
    %280 = vector.broadcast %cst_76 : f32 to vector<8x32xf32>
    %281 = arith.addf %280, %279 : vector<8x32xf32>
    %282 = arith.divf %280, %281 : vector<8x32xf32>
    %283 = vector.extract_strided_slice %270 {offsets = [0, 64], sizes = [8, 32], strides = [1, 1]} : vector<8x128xf32> to vector<8x32xf32>
    %284 = math.tanh %283 : vector<8x32xf32>
    %285 = vector.extract_strided_slice %270 {offsets = [0, 96], sizes = [8, 32], strides = [1, 1]} : vector<8x128xf32> to vector<8x32xf32>
    %286 = arith.negf %285 : vector<8x32xf32>
    %287 = math.exp %286 : vector<8x32xf32>
    %cst_77 = arith.constant 1.000000e+00 : f32
    %288 = vector.broadcast %cst_77 : f32 to vector<8x32xf32>
    %289 = arith.addf %288, %287 : vector<8x32xf32>
    %290 = arith.divf %288, %289 : vector<8x32xf32>
    %291 = arith.mulf %282, %230 : vector<8x32xf32>
    %292 = arith.mulf %276, %284 : vector<8x32xf32>
    %293 = arith.addf %291, %292 : vector<8x32xf32>
    %294 = math.tanh %293 : vector<8x32xf32>
    %295 = arith.mulf %290, %294 : vector<8x32xf32>
    %296 = tpu.concatenate %295, %260 in 1 : vector<8x32xf32>, vector<8x32xf32> -> vector<8x64xf32>
    %cst_78 = arith.constant dense<0.000000e+00> : vector<8x128xf32>
    %297 = tpu.matmul %296, %4, %cst_78 {dimension_numbers = #tpu.dot_dimension_numbers<[1], [0], [0], [1], [0, 0, 1, 1], [], []>} : vector<8x64xf32>, vector<64x128xf32>, vector<8x128xf32> -> vector<8x128xf32>
    %298 = arith.addf %297, %7 : vector<8x128xf32>
    %299 = vector.extract_strided_slice %298 {offsets = [0, 0], sizes = [8, 32], strides = [1, 1]} : vector<8x128xf32> to vector<8x32xf32>
    %300 = arith.negf %299 : vector<8x32xf32>
    %301 = math.exp %300 : vector<8x32xf32>
    %cst_79 = arith.constant 1.000000e+00 : f32
    %302 = vector.broadcast %cst_79 : f32 to vector<8x32xf32>
    %303 = arith.addf %302, %301 : vector<8x32xf32>
    %304 = arith.divf %302, %303 : vector<8x32xf32>
    %305 = vector.extract_strided_slice %298 {offsets = [0, 32], sizes = [8, 32], strides = [1, 1]} : vector<8x128xf32> to vector<8x32xf32>
    %306 = arith.negf %305 : vector<8x32xf32>
    %307 = math.exp %306 : vector<8x32xf32>
    %cst_80 = arith.constant 1.000000e+00 : f32
    %308 = vector.broadcast %cst_80 : f32 to vector<8x32xf32>
    %309 = arith.addf %308, %307 : vector<8x32xf32>
    %310 = arith.divf %308, %309 : vector<8x32xf32>
    %311 = vector.extract_strided_slice %298 {offsets = [0, 64], sizes = [8, 32], strides = [1, 1]} : vector<8x128xf32> to vector<8x32xf32>
    %312 = math.tanh %311 : vector<8x32xf32>
    %313 = vector.extract_strided_slice %298 {offsets = [0, 96], sizes = [8, 32], strides = [1, 1]} : vector<8x128xf32> to vector<8x32xf32>
    %314 = arith.negf %313 : vector<8x32xf32>
    %315 = math.exp %314 : vector<8x32xf32>
    %cst_81 = arith.constant 1.000000e+00 : f32
    %316 = vector.broadcast %cst_81 : f32 to vector<8x32xf32>
    %317 = arith.addf %316, %315 : vector<8x32xf32>
    %318 = arith.divf %316, %317 : vector<8x32xf32>
    %319 = arith.mulf %310, %258 : vector<8x32xf32>
    %320 = arith.mulf %304, %312 : vector<8x32xf32>
    %321 = arith.addf %319, %320 : vector<8x32xf32>
    %322 = math.tanh %321 : vector<8x32xf32>
    %323 = arith.mulf %318, %322 : vector<8x32xf32>
    %324 = arith.mulf %323, %10 : vector<8x32xf32>
    %cst_82 = arith.constant dense<0.000000e+00> : vector<8xf32>
    %325 = vector.multi_reduction <add>, %324, %cst_82 [1] : vector<8x32xf32> to vector<8xf32>
    %326 = vector.shape_cast %325 : vector<8xf32> to vector<8x1xf32>
    %c0_83 = arith.constant 0 : index
    %c0_84 = arith.constant 0 : index
    %c4_85 = arith.constant 4 : index
    %327 = vector.load %arg6[%c0_83, %c0_84, %c4_85] : memref<1x8x8xf32, #tpu.memory_space<vmem>>, vector<1x8x1xf32>
    %328 = vector.shape_cast %327 : vector<1x8x1xf32> to vector<8x1xf32>
    %329 = vector.shape_cast %326 : vector<8x1xf32> to vector<1x8x1xf32>
    tpu.vector_store %arg6[%c0_83, %c0_84, %c4_85], %329 {strides = array<i32>} : memref<1x8x8xf32, #tpu.memory_space<vmem>>, vector<1x8x1xf32>,
    %c5 = arith.constant 5 : index
    %c0_86 = arith.constant 0 : index
    %c0_87 = arith.constant 0 : index
    %330 = vector.load %arg1[%c5, %c0_86, %c0_87] : memref<8x8x128xf32, #tpu.memory_space<vmem>>, vector<1x8x128xf32>
    %331 = vector.shape_cast %330 : vector<1x8x128xf32> to vector<8x128xf32>
    %cst_88 = arith.constant dense<0.000000e+00> : vector<8x128xf32>
    %332 = tpu.matmul %295, %3, %cst_88 {dimension_numbers = #tpu.dot_dimension_numbers<[1], [0], [0], [1], [0, 0, 1, 1], [], []>} : vector<8x32xf32>, vector<32x128xf32>, vector<8x128xf32> -> vector<8x128xf32>
    %333 = arith.addf %331, %332 : vector<8x128xf32>
    %334 = vector.extract_strided_slice %333 {offsets = [0, 0], sizes = [8, 32], strides = [1, 1]} : vector<8x128xf32> to vector<8x32xf32>
    %335 = arith.negf %334 : vector<8x32xf32>
    %336 = math.exp %335 : vector<8x32xf32>
    %cst_89 = arith.constant 1.000000e+00 : f32
    %337 = vector.broadcast %cst_89 : f32 to vector<8x32xf32>
    %338 = arith.addf %337, %336 : vector<8x32xf32>
    %339 = arith.divf %337, %338 : vector<8x32xf32>
    %340 = vector.extract_strided_slice %333 {offsets = [0, 32], sizes = [8, 32], strides = [1, 1]} : vector<8x128xf32> to vector<8x32xf32>
    %341 = arith.negf %340 : vector<8x32xf32>
    %342 = math.exp %341 : vector<8x32xf32>
    %cst_90 = arith.constant 1.000000e+00 : f32
    %343 = vector.broadcast %cst_90 : f32 to vector<8x32xf32>
    %344 = arith.addf %343, %342 : vector<8x32xf32>
    %345 = arith.divf %343, %344 : vector<8x32xf32>
    %346 = vector.extract_strided_slice %333 {offsets = [0, 64], sizes = [8, 32], strides = [1, 1]} : vector<8x128xf32> to vector<8x32xf32>
    %347 = math.tanh %346 : vector<8x32xf32>
    %348 = vector.extract_strided_slice %333 {offsets = [0, 96], sizes = [8, 32], strides = [1, 1]} : vector<8x128xf32> to vector<8x32xf32>
    %349 = arith.negf %348 : vector<8x32xf32>
    %350 = math.exp %349 : vector<8x32xf32>
    %cst_91 = arith.constant 1.000000e+00 : f32
    %351 = vector.broadcast %cst_91 : f32 to vector<8x32xf32>
    %352 = arith.addf %351, %350 : vector<8x32xf32>
    %353 = arith.divf %351, %352 : vector<8x32xf32>
    %354 = arith.mulf %345, %293 : vector<8x32xf32>
    %355 = arith.mulf %339, %347 : vector<8x32xf32>
    %356 = arith.addf %354, %355 : vector<8x32xf32>
    %357 = math.tanh %356 : vector<8x32xf32>
    %358 = arith.mulf %353, %357 : vector<8x32xf32>
    %359 = tpu.concatenate %358, %323 in 1 : vector<8x32xf32>, vector<8x32xf32> -> vector<8x64xf32>
    %cst_92 = arith.constant dense<0.000000e+00> : vector<8x128xf32>
    %360 = tpu.matmul %359, %4, %cst_92 {dimension_numbers = #tpu.dot_dimension_numbers<[1], [0], [0], [1], [0, 0, 1, 1], [], []>} : vector<8x64xf32>, vector<64x128xf32>, vector<8x128xf32> -> vector<8x128xf32>
    %361 = arith.addf %360, %7 : vector<8x128xf32>
    %362 = vector.extract_strided_slice %361 {offsets = [0, 0], sizes = [8, 32], strides = [1, 1]} : vector<8x128xf32> to vector<8x32xf32>
    %363 = arith.negf %362 : vector<8x32xf32>
    %364 = math.exp %363 : vector<8x32xf32>
    %cst_93 = arith.constant 1.000000e+00 : f32
    %365 = vector.broadcast %cst_93 : f32 to vector<8x32xf32>
    %366 = arith.addf %365, %364 : vector<8x32xf32>
    %367 = arith.divf %365, %366 : vector<8x32xf32>
    %368 = vector.extract_strided_slice %361 {offsets = [0, 32], sizes = [8, 32], strides = [1, 1]} : vector<8x128xf32> to vector<8x32xf32>
    %369 = arith.negf %368 : vector<8x32xf32>
    %370 = math.exp %369 : vector<8x32xf32>
    %cst_94 = arith.constant 1.000000e+00 : f32
    %371 = vector.broadcast %cst_94 : f32 to vector<8x32xf32>
    %372 = arith.addf %371, %370 : vector<8x32xf32>
    %373 = arith.divf %371, %372 : vector<8x32xf32>
    %374 = vector.extract_strided_slice %361 {offsets = [0, 64], sizes = [8, 32], strides = [1, 1]} : vector<8x128xf32> to vector<8x32xf32>
    %375 = math.tanh %374 : vector<8x32xf32>
    %376 = vector.extract_strided_slice %361 {offsets = [0, 96], sizes = [8, 32], strides = [1, 1]} : vector<8x128xf32> to vector<8x32xf32>
    %377 = arith.negf %376 : vector<8x32xf32>
    %378 = math.exp %377 : vector<8x32xf32>
    %cst_95 = arith.constant 1.000000e+00 : f32
    %379 = vector.broadcast %cst_95 : f32 to vector<8x32xf32>
    %380 = arith.addf %379, %378 : vector<8x32xf32>
    %381 = arith.divf %379, %380 : vector<8x32xf32>
    %382 = arith.mulf %373, %321 : vector<8x32xf32>
    %383 = arith.mulf %367, %375 : vector<8x32xf32>
    %384 = arith.addf %382, %383 : vector<8x32xf32>
    %385 = math.tanh %384 : vector<8x32xf32>
    %386 = arith.mulf %381, %385 : vector<8x32xf32>
    %387 = arith.mulf %386, %10 : vector<8x32xf32>
    %cst_96 = arith.constant dense<0.000000e+00> : vector<8xf32>
    %388 = vector.multi_reduction <add>, %387, %cst_96 [1] : vector<8x32xf32> to vector<8xf32>
    %389 = vector.shape_cast %388 : vector<8xf32> to vector<8x1xf32>
    %c0_97 = arith.constant 0 : index
    %c0_98 = arith.constant 0 : index
    %c5_99 = arith.constant 5 : index
    %390 = vector.load %arg6[%c0_97, %c0_98, %c5_99] : memref<1x8x8xf32, #tpu.memory_space<vmem>>, vector<1x8x1xf32>
    %391 = vector.shape_cast %390 : vector<1x8x1xf32> to vector<8x1xf32>
    %392 = vector.shape_cast %389 : vector<8x1xf32> to vector<1x8x1xf32>
    tpu.vector_store %arg6[%c0_97, %c0_98, %c5_99], %392 {strides = array<i32>} : memref<1x8x8xf32, #tpu.memory_space<vmem>>, vector<1x8x1xf32>,
    %c6 = arith.constant 6 : index
    %c0_100 = arith.constant 0 : index
    %c0_101 = arith.constant 0 : index
    %393 = vector.load %arg1[%c6, %c0_100, %c0_101] : memref<8x8x128xf32, #tpu.memory_space<vmem>>, vector<1x8x128xf32>
    %394 = vector.shape_cast %393 : vector<1x8x128xf32> to vector<8x128xf32>
    %cst_102 = arith.constant dense<0.000000e+00> : vector<8x128xf32>
    %395 = tpu.matmul %358, %3, %cst_102 {dimension_numbers = #tpu.dot_dimension_numbers<[1], [0], [0], [1], [0, 0, 1, 1], [], []>} : vector<8x32xf32>, vector<32x128xf32>, vector<8x128xf32> -> vector<8x128xf32>
    %396 = arith.addf %394, %395 : vector<8x128xf32>
    %397 = vector.extract_strided_slice %396 {offsets = [0, 0], sizes = [8, 32], strides = [1, 1]} : vector<8x128xf32> to vector<8x32xf32>
    %398 = arith.negf %397 : vector<8x32xf32>
    %399 = math.exp %398 : vector<8x32xf32>
    %cst_103 = arith.constant 1.000000e+00 : f32
    %400 = vector.broadcast %cst_103 : f32 to vector<8x32xf32>
    %401 = arith.addf %400, %399 : vector<8x32xf32>
    %402 = arith.divf %400, %401 : vector<8x32xf32>
    %403 = vector.extract_strided_slice %396 {offsets = [0, 32], sizes = [8, 32], strides = [1, 1]} : vector<8x128xf32> to vector<8x32xf32>
    %404 = arith.negf %403 : vector<8x32xf32>
    %405 = math.exp %404 : vector<8x32xf32>
    %cst_104 = arith.constant 1.000000e+00 : f32
    %406 = vector.broadcast %cst_104 : f32 to vector<8x32xf32>
    %407 = arith.addf %406, %405 : vector<8x32xf32>
    %408 = arith.divf %406, %407 : vector<8x32xf32>
    %409 = vector.extract_strided_slice %396 {offsets = [0, 64], sizes = [8, 32], strides = [1, 1]} : vector<8x128xf32> to vector<8x32xf32>
    %410 = math.tanh %409 : vector<8x32xf32>
    %411 = vector.extract_strided_slice %396 {offsets = [0, 96], sizes = [8, 32], strides = [1, 1]} : vector<8x128xf32> to vector<8x32xf32>
    %412 = arith.negf %411 : vector<8x32xf32>
    %413 = math.exp %412 : vector<8x32xf32>
    %cst_105 = arith.constant 1.000000e+00 : f32
    %414 = vector.broadcast %cst_105 : f32 to vector<8x32xf32>
    %415 = arith.addf %414, %413 : vector<8x32xf32>
    %416 = arith.divf %414, %415 : vector<8x32xf32>
    %417 = arith.mulf %408, %356 : vector<8x32xf32>
    %418 = arith.mulf %402, %410 : vector<8x32xf32>
    %419 = arith.addf %417, %418 : vector<8x32xf32>
    %420 = math.tanh %419 : vector<8x32xf32>
    %421 = arith.mulf %416, %420 : vector<8x32xf32>
    %422 = tpu.concatenate %421, %386 in 1 : vector<8x32xf32>, vector<8x32xf32> -> vector<8x64xf32>
    %cst_106 = arith.constant dense<0.000000e+00> : vector<8x128xf32>
    %423 = tpu.matmul %422, %4, %cst_106 {dimension_numbers = #tpu.dot_dimension_numbers<[1], [0], [0], [1], [0, 0, 1, 1], [], []>} : vector<8x64xf32>, vector<64x128xf32>, vector<8x128xf32> -> vector<8x128xf32>
    %424 = arith.addf %423, %7 : vector<8x128xf32>
    %425 = vector.extract_strided_slice %424 {offsets = [0, 0], sizes = [8, 32], strides = [1, 1]} : vector<8x128xf32> to vector<8x32xf32>
    %426 = arith.negf %425 : vector<8x32xf32>
    %427 = math.exp %426 : vector<8x32xf32>
    %cst_107 = arith.constant 1.000000e+00 : f32
    %428 = vector.broadcast %cst_107 : f32 to vector<8x32xf32>
    %429 = arith.addf %428, %427 : vector<8x32xf32>
    %430 = arith.divf %428, %429 : vector<8x32xf32>
    %431 = vector.extract_strided_slice %424 {offsets = [0, 32], sizes = [8, 32], strides = [1, 1]} : vector<8x128xf32> to vector<8x32xf32>
    %432 = arith.negf %431 : vector<8x32xf32>
    %433 = math.exp %432 : vector<8x32xf32>
    %cst_108 = arith.constant 1.000000e+00 : f32
    %434 = vector.broadcast %cst_108 : f32 to vector<8x32xf32>
    %435 = arith.addf %434, %433 : vector<8x32xf32>
    %436 = arith.divf %434, %435 : vector<8x32xf32>
    %437 = vector.extract_strided_slice %424 {offsets = [0, 64], sizes = [8, 32], strides = [1, 1]} : vector<8x128xf32> to vector<8x32xf32>
    %438 = math.tanh %437 : vector<8x32xf32>
    %439 = vector.extract_strided_slice %424 {offsets = [0, 96], sizes = [8, 32], strides = [1, 1]} : vector<8x128xf32> to vector<8x32xf32>
    %440 = arith.negf %439 : vector<8x32xf32>
    %441 = math.exp %440 : vector<8x32xf32>
    %cst_109 = arith.constant 1.000000e+00 : f32
    %442 = vector.broadcast %cst_109 : f32 to vector<8x32xf32>
    %443 = arith.addf %442, %441 : vector<8x32xf32>
    %444 = arith.divf %442, %443 : vector<8x32xf32>
    %445 = arith.mulf %436, %384 : vector<8x32xf32>
    %446 = arith.mulf %430, %438 : vector<8x32xf32>
    %447 = arith.addf %445, %446 : vector<8x32xf32>
    %448 = math.tanh %447 : vector<8x32xf32>
    %449 = arith.mulf %444, %448 : vector<8x32xf32>
    %450 = arith.mulf %449, %10 : vector<8x32xf32>
    %cst_110 = arith.constant dense<0.000000e+00> : vector<8xf32>
    %451 = vector.multi_reduction <add>, %450, %cst_110 [1] : vector<8x32xf32> to vector<8xf32>
    %452 = vector.shape_cast %451 : vector<8xf32> to vector<8x1xf32>
    %c0_111 = arith.constant 0 : index
    %c0_112 = arith.constant 0 : index
    %c6_113 = arith.constant 6 : index
    %453 = vector.load %arg6[%c0_111, %c0_112, %c6_113] : memref<1x8x8xf32, #tpu.memory_space<vmem>>, vector<1x8x1xf32>
    %454 = vector.shape_cast %453 : vector<1x8x1xf32> to vector<8x1xf32>
    %455 = vector.shape_cast %452 : vector<8x1xf32> to vector<1x8x1xf32>
    tpu.vector_store %arg6[%c0_111, %c0_112, %c6_113], %455 {strides = array<i32>} : memref<1x8x8xf32, #tpu.memory_space<vmem>>, vector<1x8x1xf32>,
    %c7 = arith.constant 7 : index
    %c0_114 = arith.constant 0 : index
    %c0_115 = arith.constant 0 : index
    %456 = vector.load %arg1[%c7, %c0_114, %c0_115] : memref<8x8x128xf32, #tpu.memory_space<vmem>>, vector<1x8x128xf32>
    %457 = vector.shape_cast %456 : vector<1x8x128xf32> to vector<8x128xf32>
    %cst_116 = arith.constant dense<0.000000e+00> : vector<8x128xf32>
    %458 = tpu.matmul %421, %3, %cst_116 {dimension_numbers = #tpu.dot_dimension_numbers<[1], [0], [0], [1], [0, 0, 1, 1], [], []>} : vector<8x32xf32>, vector<32x128xf32>, vector<8x128xf32> -> vector<8x128xf32>
    %459 = arith.addf %457, %458 : vector<8x128xf32>
    %460 = vector.extract_strided_slice %459 {offsets = [0, 0], sizes = [8, 32], strides = [1, 1]} : vector<8x128xf32> to vector<8x32xf32>
    %461 = arith.negf %460 : vector<8x32xf32>
    %462 = math.exp %461 : vector<8x32xf32>
    %cst_117 = arith.constant 1.000000e+00 : f32
    %463 = vector.broadcast %cst_117 : f32 to vector<8x32xf32>
    %464 = arith.addf %463, %462 : vector<8x32xf32>
    %465 = arith.divf %463, %464 : vector<8x32xf32>
    %466 = vector.extract_strided_slice %459 {offsets = [0, 32], sizes = [8, 32], strides = [1, 1]} : vector<8x128xf32> to vector<8x32xf32>
    %467 = arith.negf %466 : vector<8x32xf32>
    %468 = math.exp %467 : vector<8x32xf32>
    %cst_118 = arith.constant 1.000000e+00 : f32
    %469 = vector.broadcast %cst_118 : f32 to vector<8x32xf32>
    %470 = arith.addf %469, %468 : vector<8x32xf32>
    %471 = arith.divf %469, %470 : vector<8x32xf32>
    %472 = vector.extract_strided_slice %459 {offsets = [0, 64], sizes = [8, 32], strides = [1, 1]} : vector<8x128xf32> to vector<8x32xf32>
    %473 = math.tanh %472 : vector<8x32xf32>
    %474 = vector.extract_strided_slice %459 {offsets = [0, 96], sizes = [8, 32], strides = [1, 1]} : vector<8x128xf32> to vector<8x32xf32>
    %475 = arith.negf %474 : vector<8x32xf32>
    %476 = math.exp %475 : vector<8x32xf32>
    %cst_119 = arith.constant 1.000000e+00 : f32
    %477 = vector.broadcast %cst_119 : f32 to vector<8x32xf32>
    %478 = arith.addf %477, %476 : vector<8x32xf32>
    %479 = arith.divf %477, %478 : vector<8x32xf32>
    %480 = arith.mulf %471, %419 : vector<8x32xf32>
    %481 = arith.mulf %465, %473 : vector<8x32xf32>
    %482 = arith.addf %480, %481 : vector<8x32xf32>
    %483 = math.tanh %482 : vector<8x32xf32>
    %484 = arith.mulf %479, %483 : vector<8x32xf32>
    %485 = tpu.concatenate %484, %449 in 1 : vector<8x32xf32>, vector<8x32xf32> -> vector<8x64xf32>
    %cst_120 = arith.constant dense<0.000000e+00> : vector<8x128xf32>
    %486 = tpu.matmul %485, %4, %cst_120 {dimension_numbers = #tpu.dot_dimension_numbers<[1], [0], [0], [1], [0, 0, 1, 1], [], []>} : vector<8x64xf32>, vector<64x128xf32>, vector<8x128xf32> -> vector<8x128xf32>
    %487 = arith.addf %486, %7 : vector<8x128xf32>
    %488 = vector.extract_strided_slice %487 {offsets = [0, 0], sizes = [8, 32], strides = [1, 1]} : vector<8x128xf32> to vector<8x32xf32>
    %489 = arith.negf %488 : vector<8x32xf32>
    %490 = math.exp %489 : vector<8x32xf32>
    %cst_121 = arith.constant 1.000000e+00 : f32
    %491 = vector.broadcast %cst_121 : f32 to vector<8x32xf32>
    %492 = arith.addf %491, %490 : vector<8x32xf32>
    %493 = arith.divf %491, %492 : vector<8x32xf32>
    %494 = vector.extract_strided_slice %487 {offsets = [0, 32], sizes = [8, 32], strides = [1, 1]} : vector<8x128xf32> to vector<8x32xf32>
    %495 = arith.negf %494 : vector<8x32xf32>
    %496 = math.exp %495 : vector<8x32xf32>
    %cst_122 = arith.constant 1.000000e+00 : f32
    %497 = vector.broadcast %cst_122 : f32 to vector<8x32xf32>
    %498 = arith.addf %497, %496 : vector<8x32xf32>
    %499 = arith.divf %497, %498 : vector<8x32xf32>
    %500 = vector.extract_strided_slice %487 {offsets = [0, 64], sizes = [8, 32], strides = [1, 1]} : vector<8x128xf32> to vector<8x32xf32>
    %501 = math.tanh %500 : vector<8x32xf32>
    %502 = vector.extract_strided_slice %487 {offsets = [0, 96], sizes = [8, 32], strides = [1, 1]} : vector<8x128xf32> to vector<8x32xf32>
    %503 = arith.negf %502 : vector<8x32xf32>
    %504 = math.exp %503 : vector<8x32xf32>
    %cst_123 = arith.constant 1.000000e+00 : f32
    %505 = vector.broadcast %cst_123 : f32 to vector<8x32xf32>
    %506 = arith.addf %505, %504 : vector<8x32xf32>
    %507 = arith.divf %505, %506 : vector<8x32xf32>
    %508 = arith.mulf %499, %447 : vector<8x32xf32>
    %509 = arith.mulf %493, %501 : vector<8x32xf32>
    %510 = arith.addf %508, %509 : vector<8x32xf32>
    %511 = math.tanh %510 : vector<8x32xf32>
    %512 = arith.mulf %507, %511 : vector<8x32xf32>
    %513 = arith.mulf %512, %10 : vector<8x32xf32>
    %cst_124 = arith.constant dense<0.000000e+00> : vector<8xf32>
    %514 = vector.multi_reduction <add>, %513, %cst_124 [1] : vector<8x32xf32> to vector<8xf32>
    %515 = vector.shape_cast %514 : vector<8xf32> to vector<8x1xf32>
    %c0_125 = arith.constant 0 : index
    %c0_126 = arith.constant 0 : index
    %c7_127 = arith.constant 7 : index
    %516 = vector.load %arg6[%c0_125, %c0_126, %c7_127] : memref<1x8x8xf32, #tpu.memory_space<vmem>>, vector<1x8x1xf32>
    %517 = vector.shape_cast %516 : vector<1x8x1xf32> to vector<8x1xf32>
    %518 = vector.shape_cast %515 : vector<8x1xf32> to vector<1x8x1xf32>
    tpu.vector_store %arg6[%c0_125, %c0_126, %c7_127], %518 {strides = array<i32>} : memref<1x8x8xf32, #tpu.memory_space<vmem>>, vector<1x8x1xf32>,
    %c0_128 = arith.constant 0 : index
    %c0_129 = arith.constant 0 : index
    %519 = vector.load %arg7[%c0_128, %c0_129] : memref<8x32xf32, #tpu.memory_space<vmem>>, vector<8x32xf32>
    tpu.vector_store %arg7[%c0_128, %c0_129], %484 {strides = array<i32>} : memref<8x32xf32, #tpu.memory_space<vmem>>, vector<8x32xf32>,
    %c0_130 = arith.constant 0 : index
    %c0_131 = arith.constant 0 : index
    %520 = vector.load %arg8[%c0_130, %c0_131] : memref<8x32xf32, #tpu.memory_space<vmem>>, vector<8x32xf32>
    tpu.vector_store %arg8[%c0_130, %c0_131], %482 {strides = array<i32>} : memref<8x32xf32, #tpu.memory_space<vmem>>, vector<8x32xf32>,
    %c0_132 = arith.constant 0 : index
    %c0_133 = arith.constant 0 : index
    %521 = vector.load %arg9[%c0_132, %c0_133] : memref<8x32xf32, #tpu.memory_space<vmem>>, vector<8x32xf32>
    tpu.vector_store %arg9[%c0_132, %c0_133], %512 {strides = array<i32>} : memref<8x32xf32, #tpu.memory_space<vmem>>, vector<8x32xf32>,
    %c0_134 = arith.constant 0 : index
    %c0_135 = arith.constant 0 : index
    %522 = vector.load %arg10[%c0_134, %c0_135] : memref<8x32xf32, #tpu.memory_space<vmem>>, vector<8x32xf32>
    tpu.vector_store %arg10[%c0_134, %c0_135], %510 {strides = array<i32>} : memref<8x32xf32, #tpu.memory_space<vmem>>, vector<8x32xf32>,
    return
  }
  func.func @transform_0(%arg0: i32) -> (i32, i32, i32) {
    %c0_i32 = arith.constant 0 : i32
    %c0_i32_0 = arith.constant 0 : i32
    %c0_i32_1 = arith.constant 0 : i32
    return %arg0, %c0_i32, %c0_i32_0 : i32, i32, i32
  }
  func.func @transform_1(%arg0: i32) -> (i32, i32) {
    %c0_i32 = arith.constant 0 : i32
    %c0_i32_0 = arith.constant 0 : i32
    %c0_i32_1 = arith.constant 0 : i32
    return %c0_i32, %c0_i32_0 : i32, i32
  }
  func.func @transform_2(%arg0: i32) -> (i32, i32) {
    %c0_i32 = arith.constant 0 : i32
    %c0_i32_0 = arith.constant 0 : i32
    %c0_i32_1 = arith.constant 0 : i32
    return %c0_i32, %c0_i32_0 : i32, i32
  }
  func.func @transform_3(%arg0: i32) -> (i32, i32) {
    %c0_i32 = arith.constant 0 : i32
    %c0_i32_0 = arith.constant 0 : i32
    %c0_i32_1 = arith.constant 0 : i32
    return %c0_i32, %c0_i32_0 : i32, i32
  }
  func.func @transform_4(%arg0: i32) -> (i32, i32) {
    %c0_i32 = arith.constant 0 : i32
    %c0_i32_0 = arith.constant 0 : i32
    %c0_i32_1 = arith.constant 0 : i32
    return %c0_i32, %c0_i32_0 : i32, i32
  }
  func.func @transform_5(%arg0: i32) -> (i32, i32, i32) {
    %c0_i32 = arith.constant 0 : i32
    %c0_i32_0 = arith.constant 0 : i32
    %c0_i32_1 = arith.constant 0 : i32
    return %arg0, %c0_i32, %c0_i32_0 : i32, i32, i32
  }
}

</mosaic_0001>

<bundles_post_ra>
// kernel: lstm_reg_forward.1
= control target key start
LH: loop header
LB: loop body
LE: loop exit
PB: predicated region body
PF: predicated region fallthrough
CT: control target
= control target key end

     0   :  { %vm24_vm0 = vcmask 261120   ;;  %v1387_v2 = vmov 0.0   ;;  %s1388_s27 = smov 64   ;;  %s1389_s28 = smov 32   ;;  %vm128_vm5 = vcmask 523264   ;;  %s1859_s1 = inlined_call_operand.vmem [shape: f32[32,128], index: 1, kind: input, shape index: {}]   ;;  %s1860_s0 = inlined_call_operand.vmem [shape: f32[8,8,128], index: 0, kind: input, shape index: {}]   ;;  %s1861_s2 = inlined_call_operand.vmem [shape: f32[64,128], index: 2, kind: input, shape index: {}]   ;;  %s1862_s3 = inlined_call_operand.vmem [shape: f32[1,128], index: 3, kind: input, shape index: {}]   ;;  %s1863_s4 = inlined_call_operand.vmem [shape: f32[1,32], index: 4, kind: input, shape index: {}]   ;;  %s1864_s5 = inlined_call_operand.vmem [shape: f32[1,8,8], index: 5, kind: output, shape index: {}]  }
   0x1   :  { %v1424_v0 = vld [vmem:[%s1859_s1 + $0x18] sm:$0xff]  ;;  %v1429_v1 = vld [vmem:[%s1859_s1 + $0x10] sm:$0xff]  ;;  %25 = vst.msk [vmem:[#allocation2] sm:$0xff] %vm24_vm0, %v1387_v2  ;;  %v1438_v3 = vld [vmem:[%s1859_s1 + $0x8] sm:$0xff]  ;;  %s1390_s12 = smov 96  }
   0x2   :  { %69 = vmatpush.msra.mxu0 %v1424_v0  ;;  %26 = vst.msk [vmem:[#allocation3] sm:$0xff] %vm24_vm0, %v1387_v2  ;;  %222 = vmatpush.msra.mxu2 %v1424_v0  ;;  %v1447_v4 = vld [vmem:[%s1859_s1] sm:$0xff]  ;;  %v1475_v31 = vld [vmem:[%s1861_s2 + $0x38] sm:$0xff]  ;;  %v1480_v32 = vld [vmem:[%s1861_s2 + $0x30] sm:$0xff] }
   0x3   :  { %27 = vst.msk [vmem:[#allocation4] sm:$0xff] %vm24_vm0, %v1387_v2  ;;  %v52_v6 = vld [vmem:[%s1860_s0] sm:$0xff]  ;;  %140 = vmatpush.msra.mxu1 %v1475_v31  ;;  %288 = vmatpush.msra.mxu3 %v1475_v31  ;;  %v1487_v33 = vld [vmem:[%s1861_s2 + $0x28] sm:$0xff]  ;;  %v1507_v38 = vld [vmem:[%s1861_s2 + $0x18] sm:$0xff] }
   0x4   :  { %70 = vmatpush.msra.mxu0 %v1429_v1  ;;  %28 = vst.msk [vmem:[#allocation5] sm:$0xff] %vm24_vm0, %v1387_v2  ;;  %223 = vmatpush.msra.mxu2 %v1429_v1  ;;  %v1501_v37 = vld [vmem:[%s1861_s2 + $0x20] sm:$0xff]  ;;  %v1513_v39 = vld [vmem:[%s1861_s2 + $0x10] sm:$0xff]  ;;  %v1521_v40 = vld [vmem:[%s1861_s2 + $0x8] sm:$0xff] }
   0x5   :  { %141 = vmatpush.msra.mxu1 %v1480_v32  ;;  %289 = vmatpush.msra.mxu3 %v1480_v32  ;;  %v1532_v41 = vld [vmem:[%s1861_s2] sm:$0xff]  ;;  %v1217_v46 = vld [vmem:[%s1860_s0 + $0x8] sm:$0xff] }
   0x6   :  { %71 = vmatpush.msra.mxu0 %v1438_v3  ;;  %224 = vmatpush.msra.mxu2 %v1438_v3  ;;  %v1572_v48 = vld [vmem:[%s1862_s3] ss:$0 sm:$0xff] }
   0x7   :  { %142 = vmatpush.msra.mxu1 %v1487_v33  ;;  %290 = vmatpush.msra.mxu3 %v1487_v33 }
   0x8   :  { %72 = vmatpush.msra.mxu0 %v1447_v4  ;;  %v48_v5 = vld [vmem:[#allocation2] sm:$0xff]  ;;  %225 = vmatpush.msra.mxu2 %v1447_v4 }
   0x9   :  { %1213 = vmatmul.msk.f32.vlgmr.msra.gmra.mxu0 %vm24_vm0, %v48_v5  ;;  %v49_v10 = vld [vmem:[#allocation3] sm:$0xff]  ;;  %143 = vmatpush.msra.mxu1 %v1501_v37 }
   0xa   :  { %363 = vmatpush.msrb.mxu0 %v1424_v0  ;;  %429 = vmatpush.msrb.mxu2 %v1475_v31  ;;  %v50_v36 = vld [vmem:[#allocation4] sm:$0xff] }
   0xb   :  { %291 = vmatpush.msra.mxu3 %v1501_v37  ;;  %144 = vmatpush.msra.mxu1 %v1507_v38  ;;  %v51_v42 = vld [vmem:[#allocation5] sm:$0xff] }
   0xc   :  { %364 = vmatpush.msrb.mxu0 %v1429_v1  ;;  %430 = vmatpush.msrb.mxu2 %v1480_v32 }
   0xd   :  { %292 = vmatpush.msra.mxu3 %v1507_v38  ;;  %145 = vmatpush.msra.mxu1 %v1513_v39 }
   0xe   :  { %365 = vmatpush.msrb.mxu0 %v1438_v3  ;;  %431 = vmatpush.msrb.mxu2 %v1487_v33 }
   0xf   :  { %293 = vmatpush.msra.mxu3 %v1513_v39  ;;  %146 = vmatpush.msra.mxu1 %v1521_v40 }
  0x10   :  { %366 = vmatpush.msrb.mxu0 %v1447_v4  ;;  %432 = vmatpush.msrb.mxu2 %v1501_v37 }
  0x11   :  { %294 = vmatpush.msra.mxu3 %v1521_v40  ;;  %147 = vmatpush.msra.mxu1 %v1532_v41 }
  0x12   :  { %504 = vmatpush.msra.mxu0 %v1424_v0  ;;  %433 = vmatpush.msrb.mxu2 %v1507_v38 }
  0x13   :  { %295 = vmatpush.msra.mxu3 %v1532_v41  ;;  %570 = vmatpush.msrb.mxu1 %v1475_v31 }
  0x14   :  { %505 = vmatpush.msra.mxu0 %v1429_v1  ;;  %434 = vmatpush.msrb.mxu2 %v1513_v39 }
  0x15   :  { %645 = vmatpush.msrb.mxu3 %v1424_v0  ;;  %571 = vmatpush.msrb.mxu1 %v1480_v32 }
  0x16   :  { %506 = vmatpush.msra.mxu0 %v1438_v3  ;;  %435 = vmatpush.msrb.mxu2 %v1521_v40 }
  0x17   :  { %646 = vmatpush.msrb.mxu3 %v1429_v1  ;;  %572 = vmatpush.msrb.mxu1 %v1487_v33 }
  0x18   :  { %507 = vmatpush.msra.mxu0 %v1447_v4  ;;  %436 = vmatpush.msrb.mxu2 %v1532_v41 }
  0x19   :  { %647 = vmatpush.msrb.mxu3 %v1438_v3  ;;  %573 = vmatpush.msrb.mxu1 %v1501_v37 }
  0x1b   :  { %648 = vmatpush.msrb.mxu3 %v1447_v4  ;;  %574 = vmatpush.msrb.mxu1 %v1507_v38 }
  0x1d   :  { %575 = vmatpush.msrb.mxu1 %v1513_v39 }
  0x1f   :  { %576 = vmatpush.msrb.mxu1 %v1521_v40 }
  0x21   :  { %577 = vmatpush.msrb.mxu1 %v1532_v41 }
  0x86   :  { %v74_v7 = vpop.f32.mrf.mxu0 }
  0x87   :  { %v77_v8 = vadd.f32 %v74_v7, %v52_v6 }
  0x89   :  { %1258 = vtanh.f32 %v77_v8  ;;  %v1214_v11 = vmul.f32 -1.442695, %v77_v8 }
  0x8b   :  { %1260 = vpow2.f32 %v1214_v11 }
  0x8f   :  { %v1259_v9 = vpop.eup %1258 }
  0x90   :  { %104 = vrot.lane.b32.xlu0 %v1259_v9, %s1388_s27 }
  0x91   :  { %v1261_v12 = vpop.eup %1260 }
  0x92   :  { %v81_v13 = vadd.f32 1.0, %v1261_v12 }
  0x94   :  { %1262 = vrcp.f32 %v81_v13  ;;  %v93_v19 = vand.u32 2147483648, %v81_v13  ;;  %vm87_vm2 = vweird.f32 %v81_v13  ;;  %v91_v20 = vand.u32 2147483647, %v81_v13 }
  0x96   :  { %v94_v22 = vor.u32 1.1754944e-38, %v93_v19  ;;  %vm92_vm4 = vcmp.eq.f32.partialorder %v91_v20, 8.507059e+37 }
  0x98   :  { %99 = vrot.lane.b32.xlu0 %v49_v10, %s1389_s28 }
  0x9a   :  { %v1263_v14 = vpop.eup %1262 }
  0x9b   :  { %v83_v15 = vmul.f32 %v1263_v14, %v81_v13  ;;  %vm88_vm1 = vweird.f32 %v1263_v14 }
  0x9c   :  { %vm89_vm3 = vmor %vm87_vm2, %vm88_vm1 }
  0x9d   :  { %v84_v16 = vsub.f32 1.0, %v83_v15 }
  0x9f   :  { %v85_v17 = vmul.f32 %v1263_v14, %v84_v16 }
  0xa1   :  { %v86_v18 = vadd.f32 %v1263_v14, %v85_v17 }
  0xa3   :  { %v90_v21 = vsel %vm89_vm3, %v1263_v14, %v86_v18 }
  0xa4   :  { %v95_v24 = vsel %vm92_vm4, %v94_v22, %v90_v21 }
 0x102   :  { %v105_v23 = vpop.permute.xlu0 %104 }
 0x103   :  { %v107_v25 = vmul.f32 %v105_v23, %v95_v24 }
 0x105   :  { %109 = vrot.lane.b32.xlu1 %v107_v25, %s1389_s28 }
 0x10a   :  { %v100_v26 = vpop.permute.xlu0 %99 }
 0x10b   :  { %v102_v27 = vmul.f32 %v100_v26, %v95_v24 }
 0x177   :  { %v110_v28 = vpop.permute.xlu1 %109 }
 0x178   :  { %v1468_v29 = vadd.f32 %v110_v28, %v102_v27 }
 0x17a   :  { %1264 = vtanh.f32 %v1468_v29 }
 0x180   :  { %v1265_v30 = vpop.eup %1264 }
 0x181   :  { %115 = vrot.lane.b32.xlu1 %v1265_v30, %s1388_s27 }
 0x1f3   :  { %v116_v34 = vpop.permute.xlu1 %115 }
 0x1f4   :  { %v118_v35 = vmul.f32 %v116_v34, %v95_v24 }
 0x1f6   :  { %120 = vrot.lane.b32.xlu2 %v118_v35, %s1389_s28 }
 0x1fe   :  { %124 = vrot.lane.b32.xlu2 %v50_v36, %s1389_s28 }
 0x206   :  { %173 = vrot.lane.b32.xlu2 %v51_v42, %s1389_s28 }
 0x250   :  { %v121_v43 = vpop.permute.xlu2 %120 }
 0x251   :  { %1218 = vmatmul.msk.f32.vlgmr.msra.gmra.mxu2 %vm24_vm0, %v121_v43 }
 0x252   :  { %786 = vmatpush.msra.mxu2 %v1424_v0 }
 0x254   :  { %787 = vmatpush.msra.mxu2 %v1429_v1 }
 0x256   :  { %788 = vmatpush.msra.mxu2 %v1438_v3 }
 0x258   :  { %v125_v44 = vpop.permute.xlu2 %124  ;;  %789 = vmatpush.msra.mxu2 %v1447_v4 }
 0x259   :  { %v127_v45 = vsel %vm24_vm0, %v121_v43, %v125_v44 }
 0x25a   :  { %1215 = vmatmul.msk.f32.vlgmr.msra.gmra.mxu1 %vm128_vm5, %v127_v45 }
 0x25b   :  { %1134 = vmatpush.msra.mxu1 %v1475_v31 }
 0x25d   :  { %1135 = vmatpush.msra.mxu1 %v1480_v32 }
 0x25f   :  { %1136 = vmatpush.msra.mxu1 %v1487_v33 }
 0x260   :  { %v174_v24 = vpop.permute.xlu2 %173 }
 0x261   :  { %1137 = vmatpush.msra.mxu1 %v1501_v37 }
 0x263   :  { %1138 = vmatpush.msra.mxu1 %v1507_v38 }
 0x265   :  { %1139 = vmatpush.msra.mxu1 %v1513_v39 }
 0x267   :  { %1140 = vmatpush.msra.mxu1 %v1521_v40 }
 0x269   :  { %1141 = vmatpush.msra.mxu1 %v1532_v41 }
 0x2d4   :  { %v227_v47 = vpop.f32.mrf.mxu2 }
 0x2d5   :  { %v230_v49 = vadd.f32 %v1217_v46, %v227_v47 }
 0x2d7   :  { %1266 = vtanh.f32 %v230_v49  ;;  %v149_v50 = vpop.f32.mrf.mxu1  ;;  %v1219_v54 = vmul.f32 -1.442695, %v230_v49  ;;  %v1222_v49 = vld [vmem:[%s1860_s0 + $0x10] sm:$0xff] }
 0x2d8   :  { %v150_v51 = vadd.f32 %v1572_v48, %v149_v50 }
 0x2da   :  { %1268 = vtanh.f32 %v150_v51  ;;  %v1216_v55 = vmul.f32 -1.442695, %v150_v51 }
 0x2db   :  { %1270 = vpow2.f32 %v1219_v54 }
 0x2dc   :  { %1272 = vpow2.f32 %v1216_v55 }
 0x2dd   :  { %v1267_v52 = vpop.eup %1266 }
 0x2de   :  { %253 = vrot.lane.b32.xlu1 %v1267_v52, %s1388_s27 }
 0x2e0   :  { %v1269_v53 = vpop.eup %1268 }
 0x2e1   :  { %178 = vrot.lane.b32.xlu0 %v1269_v53, %s1388_s27  ;;  %v1271_v56 = vpop.eup %1270 }
 0x2e2   :  { %v1273_v57 = vpop.eup %1272  ;;  %v234_v58 = vadd.f32 1.0, %v1271_v56 }
 0x2e3   :  { %v155_v59 = vadd.f32 1.0, %v1273_v57 }
 0x2e4   :  { %1274 = vrcp.f32 %v234_v58  ;;  %v246_v9 = vand.u32 2147483648, %v234_v58  ;;  %vm240_vm7 = vweird.f32 %v234_v58  ;;  %v244_v10 = vand.u32 2147483647, %v234_v58 }
 0x2e5   :  { %1276 = vrcp.f32 %v155_v59  ;;  %v167_v12 = vand.u32 2147483648, %v155_v59  ;;  %vm161_vm10 = vweird.f32 %v155_v59  ;;  %v165_v14 = vand.u32 2147483647, %v155_v59 }
 0x2e6   :  { %v247_v15 = vor.u32 1.1754944e-38, %v246_v9  ;;  %vm245_vm12 = vcmp.eq.f32.partialorder %v244_v10, 8.507059e+37 }
 0x2e7   :  { %v168_v19 = vor.u32 1.1754944e-38, %v167_v12  ;;  %vm166_vm13 = vcmp.eq.f32.partialorder %v165_v14, 8.507059e+37 }
 0x2ea   :  { %v1275_v60 = vpop.eup %1274 }
 0x2eb   :  { %v1277_v61 = vpop.eup %1276  ;;  %v236_v62 = vmul.f32 %v1275_v60, %v234_v58  ;;  %vm241_vm6 = vweird.f32 %v1275_v60 }
 0x2ec   :  { %v157_v63 = vmul.f32 %v1277_v61, %v155_v59  ;;  %vm162_vm8 = vweird.f32 %v1277_v61  ;;  %vm242_vm9 = vmor %vm240_vm7, %vm241_vm6 }
 0x2ed   :  { %v237_v2 = vsub.f32 1.0, %v236_v62  ;;  %vm163_vm11 = vmor %vm161_vm10, %vm162_vm8 }
 0x2ee   :  { %v158_v5 = vsub.f32 1.0, %v157_v63 }
 0x2ef   :  { %v238_v6 = vmul.f32 %v1275_v60, %v237_v2 }
 0x2f0   :  { %v159_v7 = vmul.f32 %v1277_v61, %v158_v5 }
 0x2f1   :  { %v239_v8 = vadd.f32 %v1275_v60, %v238_v6 }
 0x2f2   :  { %v160_v11 = vadd.f32 %v1277_v61, %v159_v7 }
 0x2f3   :  { %v243_v13 = vsel %vm242_vm9, %v1275_v60, %v239_v8 }
 0x2f4   :  { %v164_v16 = vsel %vm163_vm11, %v1277_v61, %v160_v11  ;;  %v248_v18 = vsel %vm245_vm12, %v247_v15, %v243_v13 }
 0x2f5   :  { %v169_v21 = vsel %vm166_vm13, %v168_v19, %v164_v16  ;;  %v251_v25 = vmul.f32 %v248_v18, %v1468_v29 }
 0x2f6   :  { %v176_v28 = vmul.f32 %v174_v24, %v169_v21 }
 0x350   :  { %v254_v17 = vpop.permute.xlu1 %253 }
 0x351   :  { %v256_v20 = vmul.f32 %v254_v17, %v248_v18 }
 0x353   :  { %258 = vrot.lane.b32.xlu1 %v256_v20, %s1389_s28  ;;  %v179_v22 = vpop.permute.xlu0 %178 }
 0x354   :  { %v181_v23 = vmul.f32 %v179_v22, %v169_v21 }
 0x356   :  { %183 = vrot.lane.b32.xlu0 %v181_v23, %s1389_s28 }
 0x3c5   :  { %v259_v26 = vpop.permute.xlu1 %258 }
 0x3c6   :  { %v1580_v27 = vadd.f32 %v259_v26, %v251_v25 }
 0x3c8   :  { %1278 = vtanh.f32 %v1580_v27  ;;  %v184_v30 = vpop.permute.xlu0 %183 }
 0x3c9   :  { %v1583_v34 = vadd.f32 %v184_v30, %v176_v28 }
 0x3cb   :  { %1280 = vtanh.f32 %v1583_v34 }
 0x3ce   :  { %v1279_v35 = vpop.eup %1278 }
 0x3cf   :  { %264 = vrot.lane.b32.xlu0 %v1279_v35, %s1388_s27 }
 0x3d1   :  { %v1281_v36 = vpop.eup %1280 }
 0x3d2   :  { %189 = vrot.lane.b32.xlu2 %v1281_v36, %s1388_s27 }
 0x42c   :  { %v190_v42 = vpop.permute.xlu2 %189 }
 0x42d   :  { %v1588_v43 = vmul.f32 %v190_v42, %v169_v21 }
 0x42f   :  { %273 = vrot.lane.b32.xlu2 %v1588_v43, %s1388_s27 }
 0x441   :  { %v265_v29 = vpop.permute.xlu0 %264 }
 0x442   :  { %v267_v44 = vmul.f32 %v265_v29, %v248_v18 }
 0x444   :  { %269 = vrot.lane.b32.xlu1 %v267_v44, %s1389_s28 }
 0x489   :  { %v274_v45 = vpop.permute.xlu2 %273 }
 0x4b6   :  { %v270_v46 = vpop.permute.xlu1 %269 }
 0x4b7   :  { %1223 = vmatmul.msk.f32.vlgmr.msrb.gmra.mxu0 %vm24_vm0, %v270_v46  ;;  %v276_v47 = vsel %vm24_vm0, %v270_v46, %v274_v45 }
 0x4b8   :  { %1220 = vmatmul.msk.f32.vlgmr.msra.gmra.mxu3 %vm128_vm5, %v276_v47  ;;  %711 = vmatpush.msrb.mxu0 %v1475_v31 }
 0x4b9   :  { %852 = vmatpush.msra.mxu3 %v1475_v31 }
 0x4ba   :  { %712 = vmatpush.msrb.mxu0 %v1480_v32 }
 0x4bb   :  { %853 = vmatpush.msra.mxu3 %v1480_v32 }
 0x4bc   :  { %713 = vmatpush.msrb.mxu0 %v1487_v33 }
 0x4bd   :  { %854 = vmatpush.msra.mxu3 %v1487_v33 }
 0x4be   :  { %714 = vmatpush.msrb.mxu0 %v1501_v37 }
 0x4bf   :  { %855 = vmatpush.msra.mxu3 %v1501_v37 }
 0x4c0   :  { %715 = vmatpush.msrb.mxu0 %v1507_v38 }
 0x4c1   :  { %856 = vmatpush.msra.mxu3 %v1507_v38 }
 0x4c2   :  { %716 = vmatpush.msrb.mxu0 %v1513_v39 }
 0x4c3   :  { %857 = vmatpush.msra.mxu3 %v1513_v39 }
 0x4c4   :  { %717 = vmatpush.msrb.mxu0 %v1521_v40 }
 0x4c5   :  { %858 = vmatpush.msra.mxu3 %v1521_v40 }
 0x4c6   :  { %718 = vmatpush.msrb.mxu0 %v1532_v41 }
 0x4c7   :  { %859 = vmatpush.msra.mxu3 %v1532_v41 }
 0x534   :  { %v368_v50 = vpop.f32.mrf.mxu0 }
 0x535   :  { %v371_v51 = vadd.f32 %v1222_v49, %v368_v50 }
 0x537   :  { %1282 = vtanh.f32 %v371_v51  ;;  %v1224_v56 = vmul.f32 -1.442695, %v371_v51  ;;  %v1227_v51 = vld [vmem:[%s1860_s0 + $0x18] sm:$0xff] }
 0x53b   :  { %v297_v52 = vpop.f32.mrf.mxu3 }
 0x53c   :  { %v298_v53 = vadd.f32 %v1572_v48, %v297_v52 }
 0x53d   :  { %v1283_v54 = vpop.eup %1282 }
 0x53e   :  { %1284 = vtanh.f32 %v298_v53  ;;  %394 = vrot.lane.b32.xlu0 %v1283_v54, %s1388_s27  ;;  %v1221_v57 = vmul.f32 -1.442695, %v298_v53 }
 0x53f   :  { %1286 = vpow2.f32 %v1224_v56 }
 0x540   :  { %1288 = vpow2.f32 %v1221_v57 }
 0x544   :  { %v1285_v55 = vpop.eup %1284 }
 0x545   :  { %322 = vrot.lane.b32.xlu1 %v1285_v55, %s1388_s27  ;;  %v1287_v58 = vpop.eup %1286 }
 0x546   :  { %v375_v59 = vadd.f32 1.0, %v1287_v58  ;;  %v1289_v60 = vpop.eup %1288 }
 0x547   :  { %v303_v61 = vadd.f32 1.0, %v1289_v60 }
 0x548   :  { %1290 = vrcp.f32 %v375_v59  ;;  %v387_v10 = vand.u32 2147483648, %v375_v59  ;;  %vm381_vm15 = vweird.f32 %v375_v59  ;;  %v385_v11 = vand.u32 2147483647, %v375_v59 }
 0x549   :  { %1292 = vrcp.f32 %v303_v61  ;;  %v315_v19 = vand.u32 2147483648, %v303_v61  ;;  %vm309_vm4 = vweird.f32 %v303_v61  ;;  %v313_v20 = vand.u32 2147483647, %v303_v61 }
 0x54a   :  { %v388_v14 = vor.u32 1.1754944e-38, %v387_v10  ;;  %vm386_vm2 = vcmp.eq.f32.partialorder %v385_v11, 8.507059e+37 }
 0x54b   :  { %v316_v22 = vor.u32 1.1754944e-38, %v315_v19  ;;  %vm314_vm7 = vcmp.eq.f32.partialorder %v313_v20, 8.507059e+37 }
 0x54e   :  { %v1291_v62 = vpop.eup %1290 }
 0x54f   :  { %v377_v63 = vmul.f32 %v1291_v62, %v375_v59  ;;  %v1293_v2 = vpop.eup %1292  ;;  %vm382_vm14 = vweird.f32 %v1291_v62 }
 0x550   :  { %v305_v6 = vmul.f32 %v1293_v2, %v303_v61  ;;  %vm383_vm1 = vmor %vm381_vm15, %vm382_vm14  ;;  %vm310_vm3 = vweird.f32 %v1293_v2 }
 0x551   :  { %v378_v5 = vsub.f32 1.0, %v377_v63  ;;  %vm311_vm6 = vmor %vm309_vm4, %vm310_vm3 }
 0x552   :  { %v306_v8 = vsub.f32 1.0, %v305_v6 }
 0x553   :  { %v379_v7 = vmul.f32 %v1291_v62, %v378_v5 }
 0x554   :  { %v307_v12 = vmul.f32 %v1293_v2, %v306_v8 }
 0x555   :  { %v380_v9 = vadd.f32 %v1291_v62, %v379_v7 }
 0x556   :  { %v308_v17 = vadd.f32 %v1293_v2, %v307_v12 }
 0x557   :  { %v384_v13 = vsel %vm383_vm1, %v1291_v62, %v380_v9 }
 0x558   :  { %v389_v16 = vsel %vm386_vm2, %v388_v14, %v384_v13  ;;  %v312_v21 = vsel %vm311_vm6, %v1293_v2, %v308_v17 }
 0x559   :  { %v317_v24 = vsel %vm314_vm7, %v316_v22, %v312_v21  ;;  %v392_v26 = vmul.f32 %v389_v16, %v1580_v27 }
 0x55a   :  { %v320_v36 = vmul.f32 %v317_v24, %v1583_v34 }
 0x5b0   :  { %v395_v15 = vpop.permute.xlu0 %394 }
 0x5b1   :  { %v397_v18 = vmul.f32 %v395_v15, %v389_v16 }
 0x5b3   :  { %399 = vrot.lane.b32.xlu2 %v397_v18, %s1389_s28 }
 0x5b7   :  { %v323_v23 = vpop.permute.xlu1 %322 }
 0x5b8   :  { %v325_v25 = vmul.f32 %v323_v23, %v317_v24 }
 0x5ba   :  { %327 = vrot.lane.b32.xlu0 %v325_v25, %s1389_s28 }
 0x60d   :  { %v400_v28 = vpop.permute.xlu2 %399 }
 0x60e   :  { %v1621_v30 = vadd.f32 %v400_v28, %v392_v26 }
 0x610   :  { %1294 = vtanh.f32 %v1621_v30 }
 0x616   :  { %v1295_v35 = vpop.eup %1294 }
 0x617   :  { %405 = vrot.lane.b32.xlu1 %v1295_v35, %s1388_s27 }
 0x62c   :  { %v328_v42 = vpop.permute.xlu0 %327 }
 0x62d   :  { %v1626_v29 = vadd.f32 %v328_v42, %v320_v36 }
 0x62f   :  { %1296 = vtanh.f32 %v1626_v29 }
 0x635   :  { %v1297_v44 = vpop.eup %1296 }
 0x636   :  { %333 = vrot.lane.b32.xlu2 %v1297_v44, %s1388_s27 }
 0x689   :  { %v406_v45 = vpop.permute.xlu1 %405 }
 0x68a   :  { %v408_v27 = vmul.f32 %v406_v45, %v389_v16 }
 0x68c   :  { %410 = vrot.lane.b32.xlu0 %v408_v27, %s1389_s28  ;;  %v1232_v27 = vld [vmem:[%s1860_s0 + $0x20] sm:$0xff] }
 0x690   :  { %v334_v46 = vpop.permute.xlu2 %333 }
 0x691   :  { %v1631_v47 = vmul.f32 %v334_v46, %v317_v24 }
 0x693   :  { %414 = vrot.lane.b32.xlu1 %v1631_v47, %s1388_s27 }
 0x6fe   :  { %v411_v49 = vpop.permute.xlu0 %410 }
 0x6ff   :  { %1228 = vmatmul.msk.f32.vlgmr.msra.gmra.mxu0 %vm24_vm0, %v411_v49 }
 0x700   :  { %1068 = vmatpush.msra.mxu0 %v1424_v0 }
 0x702   :  { %1069 = vmatpush.msra.mxu0 %v1429_v1 }
 0x704   :  { %1070 = vmatpush.msra.mxu0 %v1438_v3 }
 0x705   :  { %v415_v34 = vpop.permute.xlu1 %414 }
 0x706   :  { %v417_v50 = vsel %vm24_vm0, %v411_v49, %v415_v34  ;;  %1071 = vmatpush.msra.mxu0 %v1447_v4 }
 0x707   :  { %1225 = vmatmul.msk.f32.vlgmr.msrb.gmra.mxu2 %vm128_vm5, %v417_v50 }
 0x708   :  { %993 = vmatpush.msrb.mxu2 %v1475_v31 }
 0x70a   :  { %994 = vmatpush.msrb.mxu2 %v1480_v32 }
 0x70c   :  { %995 = vmatpush.msrb.mxu2 %v1487_v33 }
 0x70e   :  { %996 = vmatpush.msrb.mxu2 %v1501_v37 }
 0x710   :  { %997 = vmatpush.msrb.mxu2 %v1507_v38 }
 0x712   :  { %998 = vmatpush.msrb.mxu2 %v1513_v39 }
 0x714   :  { %999 = vmatpush.msrb.mxu2 %v1521_v40 }
 0x716   :  { %1000 = vmatpush.msrb.mxu2 %v1532_v41 }
 0x77c   :  { %v509_v52 = vpop.f32.mrf.mxu0 }
 0x77d   :  { %v512_v31 = vadd.f32 %v1227_v51, %v509_v52 }
 0x77f   :  { %1298 = vtanh.f32 %v512_v31  ;;  %v1229_v39 = vmul.f32 -1.442695, %v512_v31 }
 0x785   :  { %v1299_v32 = vpop.eup %1298 }
 0x786   :  { %535 = vrot.lane.b32.xlu2 %v1299_v32, %s1388_s27 }
 0x78a   :  { %v438_v33 = vpop.f32.mrf.mxu2 }
 0x78b   :  { %v439_v37 = vadd.f32 %v1572_v48, %v438_v33 }
 0x78d   :  { %1300 = vtanh.f32 %v439_v37  ;;  %v1226_v57 = vmul.f32 -1.442695, %v439_v37 }
 0x78e   :  { %1302 = vpow2.f32 %v1229_v39 }
 0x793   :  { %v1301_v38 = vpop.eup %1300 }
 0x794   :  { %463 = vrot.lane.b32.xlu0 %v1301_v38, %s1388_s27  ;;  %v1303_v40 = vpop.eup %1302 }
 0x795   :  { %v516_v41 = vadd.f32 1.0, %v1303_v40 }
 0x797   :  { %1304 = vrcp.f32 %v516_v41  ;;  %v528_v59 = vand.u32 2147483648, %v516_v41  ;;  %vm522_vm9 = vweird.f32 %v516_v41  ;;  %v526_v60 = vand.u32 2147483647, %v516_v41 }
 0x798   :  { %1306 = vpow2.f32 %v1226_v57 }
 0x799   :  { %v529_v62 = vor.u32 1.1754944e-38, %v528_v59  ;;  %vm527_vm11 = vcmp.eq.f32.partialorder %v526_v60, 8.507059e+37 }
 0x79d   :  { %v1305_v53 = vpop.eup %1304 }
 0x79e   :  { %v518_v54 = vmul.f32 %v1305_v53, %v516_v41  ;;  %vm523_vm8 = vweird.f32 %v1305_v53  ;;  %v1307_v6 = vpop.eup %1306 }
 0x79f   :  { %vm524_vm10 = vmor %vm522_vm9, %vm523_vm8  ;;  %v444_v7 = vadd.f32 1.0, %v1307_v6 }
 0x7a0   :  { %v519_v55 = vsub.f32 1.0, %v518_v54 }
 0x7a1   :  { %1308 = vrcp.f32 %v444_v7  ;;  %v456_v13 = vand.u32 2147483648, %v444_v7  ;;  %vm450_vm13 = vweird.f32 %v444_v7  ;;  %v454_v14 = vand.u32 2147483647, %v444_v7 }
 0x7a2   :  { %v520_v56 = vmul.f32 %v1305_v53, %v519_v55 }
 0x7a3   :  { %v457_v16 = vor.u32 1.1754944e-38, %v456_v13  ;;  %vm455_vm15 = vcmp.eq.f32.partialorder %v454_v14, 8.507059e+37 }
 0x7a4   :  { %v521_v58 = vadd.f32 %v1305_v53, %v520_v56 }
 0x7a6   :  { %v525_v61 = vsel %vm524_vm10, %v1305_v53, %v521_v58 }
 0x7a7   :  { %v530_v63 = vsel %vm527_vm11, %v529_v62, %v525_v61  ;;  %v1309_v8 = vpop.eup %1308 }
 0x7a8   :  { %v446_v9 = vmul.f32 %v1309_v8, %v444_v7  ;;  %vm451_vm12 = vweird.f32 %v1309_v8  ;;  %v533_v20 = vmul.f32 %v530_v63, %v1621_v30 }
 0x7a9   :  { %vm452_vm14 = vmor %vm450_vm13, %vm451_vm12 }
 0x7aa   :  { %v447_v10 = vsub.f32 1.0, %v446_v9 }
 0x7ac   :  { %v448_v11 = vmul.f32 %v1309_v8, %v447_v10 }
 0x7ae   :  { %v449_v12 = vadd.f32 %v1309_v8, %v448_v11 }
 0x7b0   :  { %v453_v15 = vsel %vm452_vm14, %v1309_v8, %v449_v12 }
 0x7b1   :  { %v458_v18 = vsel %vm455_vm15, %v457_v16, %v453_v15 }
 0x7b2   :  { %v461_v24 = vmul.f32 %v458_v18, %v1626_v29 }
 0x7e0   :  { %v536_v2 = vpop.permute.xlu2 %535 }
 0x7e1   :  { %v538_v5 = vmul.f32 %v536_v2, %v530_v63 }
 0x7e3   :  { %540 = vrot.lane.b32.xlu1 %v538_v5, %s1389_s28 }
 0x806   :  { %v464_v17 = vpop.permute.xlu0 %463 }
 0x807   :  { %v466_v19 = vmul.f32 %v464_v17, %v458_v18 }
 0x809   :  { %468 = vrot.lane.b32.xlu2 %v466_v19, %s1389_s28 }
 0x855   :  { %v541_v21 = vpop.permute.xlu1 %540 }
 0x856   :  { %v1659_v22 = vadd.f32 %v541_v21, %v533_v20 }
 0x858   :  { %1310 = vtanh.f32 %v1659_v22 }
 0x85e   :  { %v1311_v23 = vpop.eup %1310 }
 0x85f   :  { %546 = vrot.lane.b32.xlu0 %v1311_v23, %s1388_s27 }
 0x863   :  { %v469_v25 = vpop.permute.xlu2 %468 }
 0x864   :  { %v1664_v26 = vadd.f32 %v469_v25, %v461_v24 }
 0x866   :  { %1312 = vtanh.f32 %v1664_v26 }
 0x86c   :  { %v1313_v28 = vpop.eup %1312 }
 0x86d   :  { %474 = vrot.lane.b32.xlu1 %v1313_v28, %s1388_s27 }
 0x8d1   :  { %v547_v35 = vpop.permute.xlu0 %546 }
 0x8d2   :  { %v549_v30 = vmul.f32 %v547_v35, %v530_v63 }
 0x8d4   :  { %551 = vrot.lane.b32.xlu2 %v549_v30, %s1389_s28 }
 0x8df   :  { %v475_v36 = vpop.permute.xlu1 %474 }
 0x8e0   :  { %v1669_v42 = vmul.f32 %v475_v36, %v458_v18 }
 0x8e2   :  { %555 = vrot.lane.b32.xlu0 %v1669_v42, %s1388_s27 }
 0x92e   :  { %v552_v44 = vpop.permute.xlu2 %551 }
 0x92f   :  { %1233 = vmatmul.msk.f32.vlgmr.msrb.gmra.mxu3 %vm24_vm0, %v552_v44 }
 0x930   :  { %927 = vmatpush.msrb.mxu3 %v1424_v0 }
 0x932   :  { %928 = vmatpush.msrb.mxu3 %v1429_v1 }
 0x934   :  { %929 = vmatpush.msrb.mxu3 %v1438_v3 }
 0x936   :  { %930 = vmatpush.msrb.mxu3 %v1447_v4 }
 0x954   :  { %v556_v29 = vpop.permute.xlu0 %555 }
 0x955   :  { %v558_v45 = vsel %vm24_vm0, %v552_v44, %v556_v29 }
 0x956   :  { %1230 = vmatmul.msk.f32.vlgmr.msrb.gmra.mxu1 %vm128_vm5, %v558_v45 }
 0x9b2   :  { %v650_v46 = vpop.f32.mrf.mxu3 }
 0x9b3   :  { %v653_v49 = vadd.f32 %v1232_v27, %v650_v46 }
 0x9b5   :  { %1314 = vtanh.f32 %v653_v49  ;;  %v1234_v4 = vmul.f32 -1.442695, %v653_v49 }
 0x9bb   :  { %v1315_v34 = vpop.eup %1314 }
 0x9bc   :  { %676 = vrot.lane.b32.xlu1 %v1315_v34, %s1388_s27 }
 0x9d3   :  { %v579_v0 = vpop.f32.mrf.mxu1 }
 0x9d4   :  { %v580_v1 = vadd.f32 %v1572_v48, %v579_v0 }
 0x9d6   :  { %1316 = vtanh.f32 %v580_v1  ;;  %v1231_v50 = vmul.f32 -1.442695, %v580_v1 }
 0x9d7   :  { %1318 = vpow2.f32 %v1234_v4 }
 0x9d8   :  { %1320 = vpow2.f32 %v1231_v50 }
 0x9dc   :  { %v1317_v3 = vpop.eup %1316 }
 0x9dd   :  { %604 = vrot.lane.b32.xlu2 %v1317_v3, %s1388_s27  ;;  %v1319_v51 = vpop.eup %1318 }
 0x9de   :  { %v657_v52 = vadd.f32 1.0, %v1319_v51  ;;  %v1321_v31 = vpop.eup %1320 }
 0x9df   :  { %v585_v32 = vadd.f32 1.0, %v1321_v31 }
 0x9e0   :  { %1322 = vrcp.f32 %v657_v52  ;;  %v669_v54 = vand.u32 2147483648, %v657_v52  ;;  %vm663_vm2 = vweird.f32 %v657_v52  ;;  %v667_v56 = vand.u32 2147483647, %v657_v52 }
 0x9e1   :  { %1324 = vrcp.f32 %v585_v32  ;;  %v597_v2 = vand.u32 2147483648, %v585_v32  ;;  %vm591_vm7 = vweird.f32 %v585_v32  ;;  %v595_v5 = vand.u32 2147483647, %v585_v32 }
 0x9e2   :  { %v670_v58 = vor.u32 1.1754944e-38, %v669_v54  ;;  %vm668_vm4 = vcmp.eq.f32.partialorder %v667_v56, 8.507059e+37 }
 0x9e3   :  { %v598_v7 = vor.u32 1.1754944e-38, %v597_v2  ;;  %vm596_vm9 = vcmp.eq.f32.partialorder %v595_v5, 8.507059e+37 }
 0x9e6   :  { %v1323_v33 = vpop.eup %1322 }
 0x9e7   :  { %v659_v37 = vmul.f32 %v1323_v33, %v657_v52  ;;  %v1325_v39 = vpop.eup %1324  ;;  %vm664_vm1 = vweird.f32 %v1323_v33 }
 0x9e8   :  { %v587_v41 = vmul.f32 %v1325_v39, %v585_v32  ;;  %vm665_vm3 = vmor %vm663_vm2, %vm664_vm1  ;;  %vm592_vm6 = vweird.f32 %v1325_v39 }
 0x9e9   :  { %v660_v38 = vsub.f32 1.0, %v659_v37  ;;  %vm593_vm8 = vmor %vm591_vm7, %vm592_vm6 }
 0x9ea   :  { %v588_v55 = vsub.f32 1.0, %v587_v41 }
 0x9eb   :  { %v661_v40 = vmul.f32 %v1323_v33, %v660_v38 }
 0x9ec   :  { %v589_v59 = vmul.f32 %v1325_v39, %v588_v55 }
 0x9ed   :  { %v662_v53 = vadd.f32 %v1323_v33, %v661_v40 }
 0x9ee   :  { %v590_v63 = vadd.f32 %v1325_v39, %v589_v59 }
 0x9ef   :  { %v666_v57 = vsel %vm665_vm3, %v1323_v33, %v662_v53 }
 0x9f0   :  { %v671_v61 = vsel %vm668_vm4, %v670_v58, %v666_v57  ;;  %v594_v6 = vsel %vm593_vm8, %v1325_v39, %v590_v63 }
 0x9f1   :  { %v599_v9 = vsel %vm596_vm9, %v598_v7, %v594_v6  ;;  %v674_v11 = vmul.f32 %v671_v61, %v1659_v22 }
 0x9f2   :  { %v602_v14 = vmul.f32 %v599_v9, %v1664_v26  ;;  %v1237_v26 = vld [vmem:[%s1860_s0 + $0x28] sm:$0xff] }
 0xa2e   :  { %v677_v60 = vpop.permute.xlu1 %676 }
 0xa2f   :  { %v679_v62 = vmul.f32 %v677_v60, %v671_v61 }
 0xa31   :  { %681 = vrot.lane.b32.xlu0 %v679_v62, %s1389_s28 }
 0xa37   :  { %v605_v8 = vpop.permute.xlu2 %604 }
 0xa38   :  { %v607_v10 = vmul.f32 %v605_v8, %v599_v9 }
 0xa3a   :  { %609 = vrot.lane.b32.xlu1 %v607_v10, %s1389_s28 }
 0xaa3   :  { %v682_v12 = vpop.permute.xlu0 %681 }
 0xaa4   :  { %v1689_v13 = vadd.f32 %v682_v12, %v674_v11 }
 0xaa6   :  { %1326 = vtanh.f32 %v1689_v13 }
 0xaac   :  { %v1327_v15 = vpop.eup %1326  ;;  %v610_v16 = vpop.permute.xlu1 %609 }
 0xaad   :  { %v1693_v17 = vadd.f32 %v610_v16, %v602_v14  ;;  %687 = vrot.lane.b32.xlu2 %v1327_v15, %s1388_s27 }
 0xaaf   :  { %1328 = vtanh.f32 %v1693_v17 }
 0xab5   :  { %v1329_v18 = vpop.eup %1328 }
 0xab6   :  { %615 = vrot.lane.b32.xlu0 %v1329_v18, %s1388_s27 }
 0xb07   :  { %v688_v19 = vpop.permute.xlu2 %687 }
 0xb08   :  { %v690_v20 = vmul.f32 %v688_v19, %v671_v61 }
 0xb0a   :  { %692 = vrot.lane.b32.xlu1 %v690_v20, %s1389_s28  ;;  %v1242_v20 = vld [vmem:[%s1860_s0 + $0x30] sm:$0xff] }
 0xb28   :  { %v616_v21 = vpop.permute.xlu0 %615 }
 0xb29   :  { %v1699_v22 = vmul.f32 %v616_v21, %v599_v9 }
 0xb2b   :  { %696 = vrot.lane.b32.xlu2 %v1699_v22, %s1388_s27 }
 0xb7c   :  { %v693_v23 = vpop.permute.xlu1 %692 }
 0xb7d   :  { %1238 = vmatmul.msk.f32.vlgmr.msra.gmra.mxu2 %vm24_vm0, %v693_v23 }
 0xb85   :  { %v697_v24 = vpop.permute.xlu2 %696 }
 0xb86   :  { %v699_v25 = vsel %vm24_vm0, %v693_v23, %v697_v24 }
 0xb87   :  { %1235 = vmatmul.msk.f32.vlgmr.msrb.gmra.mxu0 %vm128_vm5, %v699_v25 }
 0xc00   :  { %v791_v28 = vpop.f32.mrf.mxu2 }
 0xc01   :  { %v794_v35 = vadd.f32 %v1237_v26, %v791_v28 }
 0xc03   :  { %1330 = vtanh.f32 %v794_v35  ;;  %v1239_v45 = vmul.f32 -1.442695, %v794_v35 }
 0xc04   :  { %v720_v30 = vpop.f32.mrf.mxu0 }
 0xc05   :  { %v721_v36 = vadd.f32 %v1572_v48, %v720_v30 }
 0xc07   :  { %1332 = vtanh.f32 %v721_v36  ;;  %v1236_v27 = vmul.f32 -1.442695, %v721_v36 }
 0xc08   :  { %1334 = vpow2.f32 %v1239_v45 }
 0xc09   :  { %v1331_v44 = vpop.eup %1330  ;;  %1336 = vpow2.f32 %v1236_v27 }
 0xc0a   :  { %817 = vrot.lane.b32.xlu1 %v1331_v44, %s1388_s27 }
 0xc0d   :  { %v1333_v29 = vpop.eup %1332 }
 0xc0e   :  { %745 = vrot.lane.b32.xlu0 %v1333_v29, %s1388_s27  ;;  %v1335_v46 = vpop.eup %1334 }
 0xc0f   :  { %v798_v49 = vadd.f32 1.0, %v1335_v46  ;;  %v1337_v34 = vpop.eup %1336 }
 0xc10   :  { %v726_v0 = vadd.f32 1.0, %v1337_v34 }
 0xc11   :  { %1338 = vrcp.f32 %v798_v49  ;;  %v810_v37 = vand.u32 2147483648, %v798_v49  ;;  %vm804_vm11 = vweird.f32 %v798_v49  ;;  %v808_v38 = vand.u32 2147483647, %v798_v49 }
 0xc12   :  { %1340 = vrcp.f32 %v726_v0  ;;  %v738_v53 = vand.u32 2147483648, %v726_v0  ;;  %vm732_vm15 = vweird.f32 %v726_v0  ;;  %v736_v54 = vand.u32 2147483647, %v726_v0 }
 0xc13   :  { %v811_v41 = vor.u32 1.1754944e-38, %v810_v37  ;;  %vm809_vm14 = vcmp.eq.f32.partialorder %v808_v38, 8.507059e+37 }
 0xc14   :  { %v739_v59 = vor.u32 1.1754944e-38, %v738_v53  ;;  %vm737_vm2 = vcmp.eq.f32.partialorder %v736_v54, 8.507059e+37 }
 0xc17   :  { %v1339_v1 = vpop.eup %1338 }
 0xc18   :  { %v800_v3 = vmul.f32 %v1339_v1, %v798_v49  ;;  %v1341_v4 = vpop.eup %1340  ;;  %vm805_vm10 = vweird.f32 %v1339_v1 }
 0xc19   :  { %v728_v51 = vmul.f32 %v1341_v4, %v726_v0  ;;  %vm806_vm12 = vmor %vm804_vm11, %vm805_vm10  ;;  %vm733_vm13 = vweird.f32 %v1341_v4 }
 0xc1a   :  { %v801_v50 = vsub.f32 1.0, %v800_v3  ;;  %vm734_vm1 = vmor %vm732_vm15, %vm733_vm13 }
 0xc1b   :  { %v729_v31 = vsub.f32 1.0, %v728_v51 }
 0xc1c   :  { %v802_v52 = vmul.f32 %v1339_v1, %v801_v50 }
 0xc1d   :  { %v730_v33 = vmul.f32 %v1341_v4, %v729_v31 }
 0xc1e   :  { %v803_v32 = vadd.f32 %v1339_v1, %v802_v52 }
 0xc1f   :  { %v731_v40 = vadd.f32 %v1341_v4, %v730_v33 }
 0xc20   :  { %v807_v39 = vsel %vm806_vm12, %v1339_v1, %v803_v32 }
 0xc21   :  { %v812_v56 = vsel %vm809_vm14, %v811_v41, %v807_v39  ;;  %v735_v58 = vsel %vm734_vm1, %v1341_v4, %v731_v40 }
 0xc22   :  { %v740_v61 = vsel %vm737_vm2, %v739_v59, %v735_v58  ;;  %v815_v7 = vmul.f32 %v812_v56, %v1689_v13 }
 0xc23   :  { %v743_v63 = vmul.f32 %v740_v61, %v1693_v17 }
 0xc7c   :  { %v818_v55 = vpop.permute.xlu1 %817 }
 0xc7d   :  { %v820_v57 = vmul.f32 %v818_v55, %v812_v56 }
 0xc7f   :  { %822 = vrot.lane.b32.xlu0 %v820_v57, %s1389_s28 }
 0xc80   :  { %v746_v60 = vpop.permute.xlu0 %745 }
 0xc81   :  { %v748_v62 = vmul.f32 %v746_v60, %v740_v61 }
 0xc83   :  { %750 = vrot.lane.b32.xlu2 %v748_v62, %s1389_s28 }
 0xcdd   :  { %v751_v2 = vpop.permute.xlu2 %750 }
 0xcde   :  { %v1715_v5 = vadd.f32 %v751_v2, %v743_v63 }
 0xce0   :  { %1342 = vtanh.f32 %v1715_v5 }
 0xce6   :  { %v1343_v6 = vpop.eup %1342 }
 0xce7   :  { %756 = vrot.lane.b32.xlu1 %v1343_v6, %s1388_s27 }
 0xcf1   :  { %v823_v8 = vpop.permute.xlu0 %822 }
 0xcf2   :  { %v1720_v9 = vadd.f32 %v823_v8, %v815_v7 }
 0xcf4   :  { %1344 = vtanh.f32 %v1720_v9 }
 0xcfa   :  { %v1345_v10 = vpop.eup %1344 }
 0xcfb   :  { %828 = vrot.lane.b32.xlu2 %v1345_v10, %s1388_s27 }
 0xd55   :  { %v829_v11 = vpop.permute.xlu2 %828 }
 0xd56   :  { %v831_v12 = vmul.f32 %v829_v11, %v812_v56  ;;  %v1247_v11 = vld [vmem:[%s1860_s0 + $0x38] sm:$0xff] }
 0xd58   :  { %833 = vrot.lane.b32.xlu0 %v831_v12, %s1389_s28 }
 0xd59   :  { %v757_v14 = vpop.permute.xlu1 %756 }
 0xd5a   :  { %v1725_v15 = vmul.f32 %v757_v14, %v740_v61 }
 0xd5c   :  { %837 = vrot.lane.b32.xlu1 %v1725_v15, %s1388_s27 }
 0xdca   :  { %v834_v16 = vpop.permute.xlu0 %833 }
 0xdce   :  { %v838_v13 = vpop.permute.xlu1 %837 }
 0xdcf   :  { %v840_v17 = vsel %vm24_vm0, %v834_v16, %v838_v13 }
 0xdd0   :  { %1240 = vmatmul.msk.f32.vlgmr.msra.gmra.mxu3 %vm128_vm5, %v840_v17 }
 0xdd8   :  { %1243 = vmatmul.msk.f32.vlgmr.msrb.gmra.mxu3 %vm24_vm0, %v834_v16 }
 0xe53   :  { %v861_v18 = vpop.f32.mrf.mxu3 }
 0xe54   :  { %v862_v19 = vadd.f32 %v1572_v48, %v861_v18 }
 0xe56   :  { %1346 = vtanh.f32 %v862_v19  ;;  %v1241_v26 = vmul.f32 -1.442695, %v862_v19 }
 0xe5b   :  { %v932_v21 = vpop.f32.mrf.mxu3 }
 0xe5c   :  { %v1347_v23 = vpop.eup %1346  ;;  %v935_v24 = vadd.f32 %v1242_v20, %v932_v21 }
 0xe5d   :  { %886 = vrot.lane.b32.xlu2 %v1347_v23, %s1388_s27 }
 0xe5e   :  { %1348 = vtanh.f32 %v935_v24  ;;  %v1244_v29 = vmul.f32 -1.442695, %v935_v24 }
 0xe5f   :  { %1350 = vpow2.f32 %v1241_v26 }
 0xe64   :  { %v1349_v25 = vpop.eup %1348 }
 0xe65   :  { %958 = vrot.lane.b32.xlu0 %v1349_v25, %s1388_s27  ;;  %v1351_v28 = vpop.eup %1350 }
 0xe66   :  { %v867_v35 = vadd.f32 1.0, %v1351_v28 }
 0xe68   :  { %1352 = vrcp.f32 %v867_v35  ;;  %v879_v46 = vand.u32 2147483648, %v867_v35  ;;  %vm873_vm4 = vweird.f32 %v867_v35  ;;  %v877_v49 = vand.u32 2147483647, %v867_v35 }
 0xe69   :  { %1354 = vpow2.f32 %v1244_v29 }
 0xe6a   :  { %v880_v1 = vor.u32 1.1754944e-38, %v879_v46  ;;  %vm878_vm7 = vcmp.eq.f32.partialorder %v877_v49, 8.507059e+37 }
 0xe6e   :  { %v1353_v30 = vpop.eup %1352 }
 0xe6f   :  { %v869_v36 = vmul.f32 %v1353_v30, %v867_v35  ;;  %vm874_vm3 = vweird.f32 %v1353_v30  ;;  %v1355_v34 = vpop.eup %1354 }
 0xe70   :  { %vm875_vm6 = vmor %vm873_vm4, %vm874_vm3  ;;  %v939_v3 = vadd.f32 1.0, %v1355_v34 }
 0xe71   :  { %v870_v44 = vsub.f32 1.0, %v869_v36 }
 0xe72   :  { %1356 = vrcp.f32 %v939_v3  ;;  %v951_v38 = vand.u32 2147483648, %v939_v3  ;;  %vm945_vm9 = vweird.f32 %v939_v3  ;;  %v949_v39 = vand.u32 2147483647, %v939_v3 }
 0xe73   :  { %v871_v45 = vmul.f32 %v1353_v30, %v870_v44 }
 0xe74   :  { %v952_v41 = vor.u32 1.1754944e-38, %v951_v38  ;;  %vm950_vm11 = vcmp.eq.f32.partialorder %v949_v39, 8.507059e+37 }
 0xe75   :  { %v872_v27 = vadd.f32 %v1353_v30, %v871_v45 }
 0xe77   :  { %v876_v0 = vsel %vm875_vm6, %v1353_v30, %v872_v27 }
 0xe78   :  { %v881_v50 = vsel %vm878_vm7, %v880_v1, %v876_v0  ;;  %v1357_v52 = vpop.eup %1356 }
 0xe79   :  { %v941_v31 = vmul.f32 %v1357_v52, %v939_v3  ;;  %vm946_vm8 = vweird.f32 %v1357_v52  ;;  %v884_v56 = vmul.f32 %v881_v50, %v1715_v5 }
 0xe7a   :  { %vm947_vm10 = vmor %vm945_vm9, %vm946_vm8  ;;  %vm204_vm9 = vcmask 7168  }
 0xe7b   :  { %v942_v32 = vsub.f32 1.0, %v941_v31 }
 0xe7d   :  { %v943_v33 = vmul.f32 %v1357_v52, %v942_v32 }
 0xe7f   :  { %v944_v37 = vadd.f32 %v1357_v52, %v943_v33 }
 0xe81   :  { %v948_v40 = vsel %vm947_vm10, %v1357_v52, %v944_v37  ;;  %vm345_vm10 = vcmask 15368  }
 0xe82   :  { %v953_v54 = vsel %vm950_vm11, %v952_v41, %v948_v40  ;;  %vm486_vm11 = vcmask 23568  }
 0xe83   :  { %v956_v59 = vmul.f32 %v953_v54, %v1720_v9 }
 0xeb7   :  { %v887_v4 = vpop.permute.xlu2 %886 }
 0xeb8   :  { %v889_v51 = vmul.f32 %v887_v4, %v881_v50 }
 0xeba   :  { %891 = vrot.lane.b32.xlu1 %v889_v51, %s1389_s28 }
 0xed7   :  { %v959_v53 = vpop.permute.xlu0 %958 }
 0xed8   :  { %v961_v55 = vmul.f32 %v959_v53, %v953_v54 }
 0xeda   :  { %963 = vrot.lane.b32.xlu2 %v961_v55, %s1389_s28 }
 0xf2c   :  { %v892_v57 = vpop.permute.xlu1 %891 }
 0xf2d   :  { %v1741_v58 = vadd.f32 %v892_v57, %v884_v56 }
 0xf2f   :  { %1358 = vtanh.f32 %v1741_v58 }
 0xf34   :  { %v964_v60 = vpop.permute.xlu2 %963 }
 0xf35   :  { %v1359_v61 = vpop.eup %1358  ;;  %v1745_v62 = vadd.f32 %v964_v60, %v956_v59  ;;  %v1257_v60 = vld [vmem:[%s1863_s4] ss:$0 sm:$0xff] }
 0xf36   :  { %897 = vrot.lane.b32.xlu0 %v1359_v61, %s1388_s27 }
 0xf37   :  { %1360 = vtanh.f32 %v1745_v62 }
 0xf3d   :  { %v1361_v63 = vpop.eup %1360 }
 0xf3e   :  { %969 = vrot.lane.b32.xlu1 %v1361_v63, %s1388_s27 }
 0xfa8   :  { %v898_v2 = vpop.permute.xlu0 %897 }
 0xfa9   :  { %v1750_v5 = vmul.f32 %v898_v2, %v881_v50 }
 0xfab   :  { %978 = vrot.lane.b32.xlu0 %v1750_v5, %s1388_s27 }
 0xfb0   :  { %v970_v6 = vpop.permute.xlu1 %969 }
 0xfb1   :  { %v972_v7 = vmul.f32 %v970_v6, %v953_v54 }
 0xfb3   :  { %974 = vrot.lane.b32.xlu2 %v972_v7, %s1389_s28 }
0x100d   :  { %v975_v8 = vpop.permute.xlu2 %974 }
0x100e   :  { %1248 = vmatmul.msk.f32.vlgmr.msra.gmra.mxu0 %vm24_vm0, %v975_v8 }
0x101d   :  { %v979_v9 = vpop.permute.xlu0 %978 }
0x101e   :  { %v981_v10 = vsel %vm24_vm0, %v975_v8, %v979_v9 }
0x101f   :  { %1245 = vmatmul.msk.f32.vlgmr.msrb.gmra.mxu2 %vm128_vm5, %v981_v10 }
0x108b   :  { %v1073_v12 = vpop.f32.mrf.mxu0 }
0x108c   :  { %v1076_v14 = vadd.f32 %v1247_v11, %v1073_v12 }
0x108e   :  { %1362 = vtanh.f32 %v1076_v14  ;;  %v1249_v19 = vmul.f32 -1.442695, %v1076_v14 }
0x1094   :  { %v1363_v16 = vpop.eup %1362 }
0x1095   :  { %1099 = vrot.lane.b32.xlu2 %v1363_v16, %s1388_s27 }
0x10a2   :  { %v1002_v13 = vpop.f32.mrf.mxu2 }
0x10a3   :  { %v1003_v17 = vadd.f32 %v1572_v48, %v1002_v13 }
0x10a5   :  { %1364 = vtanh.f32 %v1003_v17  ;;  %v1246_v27 = vmul.f32 -1.442695, %v1003_v17 }
0x10a6   :  { %1366 = vpow2.f32 %v1249_v19 }
0x10ab   :  { %v1365_v18 = vpop.eup %1364 }
0x10ac   :  { %1027 = vrot.lane.b32.xlu1 %v1365_v18, %s1388_s27  ;;  %v1367_v20 = vpop.eup %1366 }
0x10ad   :  { %v1080_v21 = vadd.f32 1.0, %v1367_v20 }
0x10af   :  { %1368 = vrcp.f32 %v1080_v21  ;;  %v1092_v35 = vand.u32 2147483648, %v1080_v21  ;;  %vm1086_vm13 = vweird.f32 %v1080_v21  ;;  %v1090_v30 = vand.u32 2147483647, %v1080_v21 }
0x10b0   :  { %1370 = vpow2.f32 %v1246_v27 }
0x10b1   :  { %v1093_v36 = vor.u32 1.1754944e-38, %v1092_v35  ;;  %vm1091_vm15 = vcmp.eq.f32.partialorder %v1090_v30, 8.507059e+37 }
0x10b5   :  { %v1369_v23 = vpop.eup %1368 }
0x10b6   :  { %v1082_v24 = vmul.f32 %v1369_v23, %v1080_v21  ;;  %vm1087_vm12 = vweird.f32 %v1369_v23  ;;  %v1371_v46 = vpop.eup %1370 }
0x10b7   :  { %vm1088_vm14 = vmor %vm1086_vm13, %vm1087_vm12  ;;  %v1008_v49 = vadd.f32 1.0, %v1371_v46  ;;  %vm627_vm12 = vcmask 31768   ;;  %vm768_vm13 = vcmask 39968  }
0x10b8   :  { %v1083_v25 = vsub.f32 1.0, %v1082_v24 }
0x10b9   :  { %1372 = vrcp.f32 %v1008_v49  ;;  %v1020_v50 = vand.u32 2147483648, %v1008_v49  ;;  %vm1014_vm2 = vweird.f32 %v1008_v49  ;;  %v1018_v51 = vand.u32 2147483647, %v1008_v49 }
0x10ba   :  { %v1084_v26 = vmul.f32 %v1369_v23, %v1083_v25 }
0x10bb   :  { %v1021_v31 = vor.u32 1.1754944e-38, %v1020_v50  ;;  %vm1019_vm4 = vcmp.eq.f32.partialorder %v1018_v51, 8.507059e+37 }
0x10bc   :  { %v1085_v28 = vadd.f32 %v1369_v23, %v1084_v26 }
0x10be   :  { %v1089_v48 = vsel %vm1088_vm14, %v1369_v23, %v1085_v28  ;;  %vm909_vm14 = vcmask 48168  }
0x10bf   :  { %v1094_v29 = vsel %vm1091_vm15, %v1093_v36, %v1089_v48  ;;  %v1373_v34 = vpop.eup %1372  ;;  %vm1050_vm15 = vcmask 56368  }
0x10c0   :  { %v1010_v0 = vmul.f32 %v1373_v34, %v1008_v49  ;;  %vm1015_vm1 = vweird.f32 %v1373_v34  ;;  %v1097_v38 = vmul.f32 %v1094_v29, %v1745_v62 }
0x10c1   :  { %vm1016_vm3 = vmor %vm1014_vm2, %vm1015_vm1  ;;  %vm1191_vm1 = vcmask 64568  }
0x10c2   :  { %v1011_v1 = vsub.f32 1.0, %v1010_v0 }
0x10c4   :  { %v1012_v3 = vmul.f32 %v1373_v34, %v1011_v1 }
0x10c6   :  { %v1013_v4 = vadd.f32 %v1373_v34, %v1012_v3 }
0x10c8   :  { %v1017_v52 = vsel %vm1016_vm3, %v1373_v34, %v1013_v4 }
0x10c9   :  { %v1022_v33 = vsel %vm1019_vm4, %v1021_v31, %v1017_v52 }
0x10ca   :  { %v1025_v53 = vmul.f32 %v1022_v33, %v1741_v58 }
0x10ef   :  { %v1100_v44 = vpop.permute.xlu2 %1099 }
0x10f0   :  { %v1102_v45 = vmul.f32 %v1100_v44, %v1094_v29 }
0x10f2   :  { %1104 = vrot.lane.b32.xlu1 %v1102_v45, %s1389_s28 }
0x111e   :  { %v1028_v32 = vpop.permute.xlu1 %1027 }
0x111f   :  { %v1030_v37 = vmul.f32 %v1028_v32, %v1022_v33 }
0x1121   :  { %1032 = vrot.lane.b32.xlu0 %v1030_v37, %s1389_s28 }
0x1164   :  { %v1105_v39 = vpop.permute.xlu1 %1104 }
0x1165   :  { %v1767_v40 = vadd.f32 %v1105_v39, %v1097_v38 }
0x1167   :  { %1374 = vtanh.f32 %v1767_v40 }
0x116d   :  { %v1375_v41 = vpop.eup %1374 }
0x116e   :  { %1110 = vrot.lane.b32.xlu0 %v1375_v41, %s1388_s27 }
0x1193   :  { %v1033_v54 = vpop.permute.xlu0 %1032 }
0x1194   :  { %v1772_v55 = vadd.f32 %v1033_v54, %v1025_v53 }
0x1196   :  { %1376 = vtanh.f32 %v1772_v55 }
0x119c   :  { %v1377_v56 = vpop.eup %1376 }
0x119d   :  { %1038 = vrot.lane.b32.xlu2 %v1377_v56, %s1388_s27 }
0x11e0   :  { %v1111_v57 = vpop.permute.xlu0 %1110 }
0x11e1   :  { %v1113_v59 = vmul.f32 %v1111_v57, %v1094_v29 }
0x11e3   :  { %1115 = vrot.lane.b32.xlu1 %v1113_v59, %s1389_s28 }
0x11eb   :  { %193 = vrot.lane.b32.xlu1 %v1257_v60, %s1390_s12 }
0x11f7   :  { %v1039_v58 = vpop.permute.xlu2 %1038 }
0x11f8   :  { %v1781_v61 = vmul.f32 %v1039_v58, %v1022_v33 }
0x11fa   :  { %1119 = vrot.lane.b32.xlu2 %v1781_v61, %s1388_s27 }
0x1254   :  { %v1120_v62 = vpop.permute.xlu2 %1119 }
0x1255   :  { %v1116_v63 = vpop.permute.xlu1 %1115 }
0x1256   :  { %v1122_v2 = vsel %vm24_vm0, %v1116_v63, %v1120_v62  ;;  %1193 = vst.msk [vmem:[#allocation2] sm:$0xff] %vm24_vm0, %v1116_v63 }
0x1257   :  { %1250 = vmatmul.msk.f32.vlgmr.msra.gmra.mxu1 %vm128_vm5, %v1122_v2 }
0x125d   :  { %v1788_v6 = vpop.permute.xlu1 %193 }
0x125e   :  { %v196_v7 = vmul.f32 %v1788_v6, %v1588_v43  ;;  %v337_v8 = vmul.f32 %v1631_v47, %v1788_v6  ;;  %v478_v9 = vmul.f32 %v1669_v42, %v1788_v6  ;;  %v1386_v43 = vld [vmem:[%s1862_s3] ss:$0 sm:$0xff]  ;;  %v619_v27 = vmul.f32 %v1699_v22, %v1788_v6 }
0x125f   :  { %v760_v1 = vmul.f32 %v1725_v15, %v1788_v6  ;;  %v901_v3 = vmul.f32 %v1750_v5, %v1788_v6  ;;  %v1042_v38 = vmul.f32 %v1781_v61, %v1788_v6 }
0x1260   :  { %198 = vrot.lane.b32.xlu2 %v196_v7, %s1389_s28 }
0x1268   :  { %339 = vrot.lane.b32.xlu2 %v337_v8, %s1389_s28 }
0x1270   :  { %480 = vrot.lane.b32.xlu2 %v478_v9, %s1389_s28 }
0x12ba   :  { %v199_v10 = vpop.permute.xlu2 %198 }
0x12bb   :  { %v201_v42 = vsel %vm24_vm0, %v199_v10, 0.0 }
0x12c2   :  { %v340_v11 = vpop.permute.xlu2 %339 }
0x12c3   :  { %v342_v45 = vsel %vm24_vm0, %v340_v11, 0.0 }
0x12ca   :  { %v481_v12 = vpop.permute.xlu2 %480 }
0x12cb   :  { %v483_v14 = vsel %vm24_vm0, %v481_v12, 0.0 }
0x12cc   :  { %484 = vadd.xlane.f32.xlu2 %v483_v14 }
0x12d4   :  { %v1143_v16 = vpop.f32.mrf.mxu1 }
0x12d5   :  { %v1144_v13 = vadd.f32 %v1386_v43, %v1143_v16 }
0x12d7   :  { %1378 = vtanh.f32 %v1144_v13  ;;  %v1251_v17 = vmul.f32 -1.442695, %v1144_v13 }
0x12d9   :  { %1380 = vpow2.f32 %v1251_v17 }
0x12dd   :  { %v1379_v47 = vpop.eup %1378 }
0x12de   :  { %1168 = vrot.lane.b32.xlu0 %v1379_v47, %s1388_s27 }
0x12df   :  { %v1381_v18 = vpop.eup %1380 }
0x12e0   :  { %v1149_v19 = vadd.f32 1.0, %v1381_v18 }
0x12e2   :  { %1382 = vrcp.f32 %v1149_v19  ;;  %v1161_v26 = vand.u32 2147483648, %v1149_v19  ;;  %vm1155_vm6 = vweird.f32 %v1149_v19  ;;  %v1159_v28 = vand.u32 2147483647, %v1149_v19 }
0x12e4   :  { %v1162_v30 = vor.u32 1.1754944e-38, %v1161_v26  ;;  %vm1160_vm8 = vcmp.eq.f32.partialorder %v1159_v28, 8.507059e+37 }
0x12e8   :  { %v1383_v20 = vpop.eup %1382 }
0x12e9   :  { %v1151_v21 = vmul.f32 %v1383_v20, %v1149_v19  ;;  %vm1156_vm5 = vweird.f32 %v1383_v20 }
0x12ea   :  { %vm1157_vm7 = vmor %vm1155_vm6, %vm1156_vm5 }
0x12eb   :  { %v1152_v23 = vsub.f32 1.0, %v1151_v21 }
0x12ed   :  { %v1153_v24 = vmul.f32 %v1383_v20, %v1152_v23 }
0x12ef   :  { %v1154_v25 = vadd.f32 %v1383_v20, %v1153_v24 }
0x12f1   :  { %v1158_v35 = vsel %vm1157_vm7, %v1383_v20, %v1154_v25 }
0x12f2   :  { %v1163_v36 = vsel %vm1160_vm8, %v1162_v30, %v1158_v35 }
0x12f3   :  { %v1166_v46 = vmul.f32 %v1163_v36, %v1772_v55 }
0x1308   :  { %202 = vadd.xlane.f32.xlu0 %v201_v42 }
0x133f   :  { %v485_v4 = vpop.xlane.xlu2 %484 }
0x1350   :  { %v1169_v48 = vpop.permute.xlu0 %1168 }
0x1351   :  { %v1171_v44 = vmul.f32 %v1169_v48, %v1163_v36 }
0x1353   :  { %1173 = vrot.lane.b32.xlu1 %v1171_v44, %s1389_s28 }
0x137b   :  { %v203_v29 = vpop.xlane.xlu0 %202 }
0x137c   :  { %205 = vst.msk [vmem:[%s1864_s5] sm:$0xff] %vm204_vm9, %v203_v29 }
0x137d   :  { %343 = vadd.xlane.f32.xlu1 %v342_v45 }
0x1396   :  { %621 = vrot.lane.b32.xlu1 %v619_v27, %s1389_s28 }
0x13c5   :  { %v1174_v49 = vpop.permute.xlu1 %1173 }
0x13c6   :  { %v1176_v34 = vadd.f32 %v1174_v49, %v1166_v46 }
0x13c8   :  { %1384 = vtanh.f32 %v1176_v34 }
0x13ce   :  { %v1385_v0 = vpop.eup %1384 }
0x13cf   :  { %1179 = vrot.lane.b32.xlu0 %v1385_v0, %s1388_s27 }
0x13d7   :  { %762 = vrot.lane.b32.xlu0 %v760_v1, %s1389_s28 }
0x13df   :  { %903 = vrot.lane.b32.xlu0 %v901_v3, %s1389_s28 }
0x13f0   :  { %v344_v22 = vpop.xlane.xlu1 %343 }
0x13f1   :  { %346 = vst.msk [vmem:[%s1864_s5] sm:$0xff] %vm345_vm10, %v344_v22 }
0x13f2   :  { %487 = vst.msk [vmem:[%s1864_s5] sm:$0xff] %vm486_vm11, %v485_v4 }
0x1408   :  { %v622_v15 = vpop.permute.xlu1 %621 }
0x1409   :  { %v624_v50 = vsel %vm24_vm0, %v622_v15, 0.0 }
0x140a   :  { %625 = vadd.xlane.f32.xlu2 %v624_v50 }
0x1441   :  { %v1180_v51 = vpop.permute.xlu0 %1179 }
0x1442   :  { %v1182_v5 = vmul.f32 %v1180_v51, %v1163_v36 }
0x1444   :  { %v1183_v52 = vmul.f32 %v1182_v5, %v1788_v6 }
0x1446   :  { %1185 = vrot.lane.b32.xlu1 %v1183_v52, %s1389_s28 }
0x1449   :  { %v763_v31 = vpop.permute.xlu0 %762 }
0x144a   :  { %v765_v32 = vsel %vm24_vm0, %v763_v31, 0.0 }
0x144b   :  { %766 = vadd.xlane.f32.xlu2 %v765_v32 }
0x1451   :  { %v904_v33 = vpop.permute.xlu0 %903 }
0x1452   :  { %v906_v37 = vsel %vm24_vm0, %v904_v33, 0.0 }
0x1453   :  { %907 = vadd.xlane.f32.xlu0 %v906_v37 }
0x1463   :  { %1044 = vrot.lane.b32.xlu2 %v1042_v38, %s1389_s28 }
0x1467   :  { %1195 = vrot.lane.b32.xlu0 %v1767_v40, %s1390_s12 }
0x147d   :  { %v626_v39 = vpop.xlane.xlu2 %625 }
0x147e   :  { %628 = vst.msk [vmem:[%s1864_s5] sm:$0xff] %vm627_vm12, %v626_v39 }
0x14b8   :  { %v1186_v41 = vpop.permute.xlu1 %1185 }
0x14b9   :  { %v1188_v53 = vsel %vm24_vm0, %v1186_v41, 0.0 }
0x14ba   :  { %1189 = vadd.xlane.f32.xlu2 %v1188_v53 }
0x14be   :  { %v767_v54 = vpop.xlane.xlu2 %766 }
0x14bf   :  { %769 = vst.msk [vmem:[%s1864_s5] sm:$0xff] %vm768_vm13, %v767_v54 }
0x14c6   :  { %v908_v55 = vpop.xlane.xlu0 %907  ;;  %v1045_v56 = vpop.permute.xlu2 %1044 }
0x14c7   :  { %910 = vst.msk [vmem:[%s1864_s5] sm:$0xff] %vm909_vm14, %v908_v55  ;;  %v1047_v40 = vsel %vm24_vm0, %v1045_v56, 0.0 }
0x14c8   :  { %1048 = vadd.xlane.f32.xlu1 %v1047_v40 }
0x14d2   :  { %1205 = vrot.lane.b32.xlu2 %v1176_v34, %s1390_s12 }
0x14d9   :  { %v1196_v57 = vpop.permute.xlu0 %1195 }
0x14da   :  { %1198 = vst.msk [vmem:[#allocation3] sm:$0xff] %vm24_vm0, %v1196_v57 }
0x14e1   :  { %1200 = vrot.lane.b32.xlu1 %v1182_v5, %s1389_s28 }
0x152d   :  { %v1190_v59 = vpop.xlane.xlu2 %1189 }
0x1535   :  { %v1206_v60 = vpop.permute.xlu2 %1205 }
0x1536   :  { %1208 = vst.msk [vmem:[#allocation5] sm:$0xff] %vm24_vm0, %v1206_v60 }
0x153b   :  { %v1049_v58 = vpop.xlane.xlu1 %1048 }
0x153c   :  { %1051 = vst.msk [vmem:[%s1864_s5] sm:$0xff] %vm1050_vm15, %v1049_v58 }
0x153d   :  { %1192 = vst.msk [vmem:[%s1864_s5] sm:$0xff] %vm1191_vm1, %v1190_v59 }
0x1553   :  { %v1201_v61 = vpop.permute.xlu1 %1200 }
0x1554   :  { %1203 = vst.msk [vmem:[#allocation4] sm:$0xff] %vm24_vm0, %v1201_v61 }

</bundles_post_ra>
